<compile_context>
chip_gen: v7x
topology: tpu7x:2x2x1
jax: 0.10.0
libtpu: 0.0.40
codegen_flags: <defaults>
</compile_context>

<pallas_src>
import numpy as np
import jax
import jax.numpy as jnp
from jax.experimental import pallas as pl
from jax.experimental.pallas import tpu as pltpu

BN_EPS = 1e-5


# ---------------------------------------------------------------------------
# Fused kernel
# ---------------------------------------------------------------------------

def _lenet_kernel(x_ref,
                  w1b_ref, b1l_ref, sl1e_ref, sl1o_ref, sr1e_ref, sr1o_ref,
                  g1_ref, g1t_ref, gamma1_ref, beta1_ref,
                  w2b_ref, b2l_ref, sl2e_ref, sl2o_ref, sr2e_ref, sr2o_ref,
                  g2_ref, g2t_ref, gamma2_ref, beta2_ref,
                  wfc_ref, beff_ref, o_ref):
    n_batch = x_ref.shape[0]

    def dot(a, b):
        return jnp.dot(a, b, preferred_element_type=jnp.float32)

    def conv_pool_relu(img, wb_ref, bias_lanes, sle, slo, sre, sro, out_rows):
        # img: [H, W*Cin], lanes = (w, cin). Conv(5x5, valid) as a sum of 5
        # row-shifted banded matmuls; then 2x2 max-pool via 0/1 selection
        # matmuls (cols, then rows); then ReLU.
        acc = dot(img[0:out_rows, :], wb_ref[0])
        for i in range(1, 5):
            acc = acc + dot(img[i:i + out_rows, :], wb_ref[i])
        acc = acc + bias_lanes                                    # conv bias
        colmax = jnp.maximum(dot(acc, sle), dot(acc, slo))        # pool width
        pooled = jnp.maximum(dot(sre, colmax), dot(sro, colmax))  # pool height
        return jnp.maximum(pooled, 0.0)                           # relu

    def batchnorm(acts, g, gt, gamma, beta, count):
        # acts: per-image [rows, width*C]; per-channel training-mode stats,
        # single pass (sum + sum-of-squares), biased variance.
        s = jnp.sum(acts[0], axis=0, keepdims=True)
        sq = jnp.sum(acts[0] * acts[0], axis=0, keepdims=True)
        for a in acts[1:]:
            s = s + jnp.sum(a, axis=0, keepdims=True)
            sq = sq + jnp.sum(a * a, axis=0, keepdims=True)
        mean = dot(s, g) * (1.0 / count)                          # [1, C]
        ex2 = dot(sq, g) * (1.0 / count)
        var = ex2 - mean * mean
        scale_c = gamma * jax.lax.rsqrt(var + BN_EPS)
        shift_c = beta - mean * scale_c
        scale_l = dot(scale_c, gt)                                # back to lanes
        shift_l = dot(shift_c, gt)
        return [a * scale_l + shift_l for a in acts]

    # ---- stage 1: conv1(1->C1, 5x5) -> maxpool2 -> relu -> bn1 ----
    b1l = b1l_ref[...]
    sl1e, sl1o = sl1e_ref[...], sl1o_ref[...]
    sr1e, sr1o = sr1e_ref[...], sr1o_ref[...]
    a1 = [conv_pool_relu(x_ref[n], w1b_ref, b1l, sl1e, sl1o, sr1e, sr1o, 24)
          for n in range(n_batch)]                                # [12, 12*C1]
    a1 = batchnorm(a1, g1_ref[...], g1t_ref[...],
                   gamma1_ref[...], beta1_ref[...], n_batch * 12 * 12)

    # ---- stage 2: conv2(C1->C2, 5x5) -> maxpool2 -> relu -> bn2 ----
    b2l = b2l_ref[...]
    sl2e, sl2o = sl2e_ref[...], sl2o_ref[...]
    sr2e, sr2o = sr2e_ref[...], sr2o_ref[...]
    a2 = [conv_pool_relu(a1[n], w2b_ref, b2l, sl2e, sl2o, sr2e, sr2o, 8)
          for n in range(n_batch)]                                # [4, 4*C2]
    a2 = batchnorm(a2, g2_ref[...], g2t_ref[...],
                   gamma2_ref[...], beta2_ref[...], n_batch * 4 * 4)

    # ---- stage 3: collapsed c5 -> f6 -> out7 (single affine map) ----
    beff = beff_ref[...]                                          # [1, 10]
    for n in range(n_batch):
        out_n = beff
        for h in range(4):
            out_n = out_n + dot(a2[n][h:h + 1, :], wfc_ref[h])    # [1, 10]
        o_ref[pl.ds(n, 1), :] = out_n


# ---------------------------------------------------------------------------
# Wrapper-side constant builders (numpy, batch independent)
# ---------------------------------------------------------------------------

def _band_template(k, in_w, out_w):
    t = np.zeros((k, in_w, out_w), np.float32)
    for j in range(k):
        for o in range(out_w):
            t[j, o + j, o] = 1.0
    return t


def _pool_col_sel(out_w, c, parity):
    s = np.zeros((2 * out_w * c, out_w * c), np.float32)
    for q in range(out_w):
        for ch in range(c):
            s[(2 * q + parity) * c + ch, q * c + ch] = 1.0
    return s


def _pool_row_sel(out_h, parity):
    s = np.zeros((out_h, 2 * out_h), np.float32)
    for r in range(out_h):
        s[r, 2 * r + parity] = 1.0
    return s


def _group_sum(out_w, c):
    g = np.zeros((out_w * c, c), np.float32)
    for q in range(out_w):
        for ch in range(c):
            g[q * c + ch, ch] = 1.0
    return g


# ---------------------------------------------------------------------------
# Forward pass
# ---------------------------------------------------------------------------

def lenet_forward(x_nchw, params):
    assert x_nchw.shape[1:] == (1, 28, 28), "LeNet expects [N, 1, 28, 28]"
    n = x_nchw.shape[0]
    c1 = params["w1"].shape[0]
    c2 = params["w2"].shape[0]
    f32 = jnp.float32

    # conv1 as 5 row-shifted banded matmuls: w1b[i] : [28, 24*C1]
    t1 = jnp.asarray(_band_template(5, 28, 24))
    w1b = jnp.einsum("cij,jwo->iwoc", params["w1"].reshape(c1, 5, 5), t1)
    w1b = w1b.reshape(5, 28, 24 * c1)
    b1l = jnp.tile(params["b1"], 24).reshape(1, 24 * c1)

    # conv2: w2b[i] : [12*C1, 8*C2]
    t2 = jnp.asarray(_band_template(5, 12, 8))
    w2b = jnp.einsum("dcij,jwo->iwcod", params["w2"], t2)
    w2b = w2b.reshape(5, 12 * c1, 8 * c2)
    b2l = jnp.tile(params["b2"], 8).reshape(1, 8 * c2)

    # pooling / per-channel group-sum selection constants
    sl1e = jnp.asarray(_pool_col_sel(12, c1, 0))
    sl1o = jnp.asarray(_pool_col_sel(12, c1, 1))
    sr1e = jnp.asarray(_pool_row_sel(12, 0))
    sr1o = jnp.asarray(_pool_row_sel(12, 1))
    g1m = jnp.asarray(_group_sum(12, c1))
    g1t = jnp.asarray(_group_sum(12, c1).T)
    sl2e = jnp.asarray(_pool_col_sel(4, c2, 0))
    sl2o = jnp.asarray(_pool_col_sel(4, c2, 1))
    sr2e = jnp.asarray(_pool_row_sel(4, 0))
    sr2o = jnp.asarray(_pool_row_sel(4, 1))
    g2m = jnp.asarray(_group_sum(4, c2))
    g2t = jnp.asarray(_group_sum(4, c2).T)

    gamma1 = params["g1"].reshape(1, c1)
    beta1 = params["be1"].reshape(1, c1)
    gamma2 = params["g2"].reshape(1, c2)
    beta2 = params["be2"].reshape(1, c2)

    # collapse c5 -> f6 -> out7 (no activations in between) into one affine map
    weff = params["w5"].T @ params["w6"].T @ params["w7"].T          # [C2*16, 10]
    beff = ((params["b5"] @ params["w6"].T + params["b6"]) @ params["w7"].T
            + params["b7"]).reshape(1, -1)
    # reorder features to the kernel's [h, w*C2 + co] activation layout
    wfc = weff.reshape(c2, 4, 4, 10).transpose(1, 2, 0, 3).reshape(4, 4 * c2, 10)

    x3 = x_nchw.reshape(n, 28, 28).astype(f32)

    args = (x3,
            w1b, b1l, sl1e, sl1o, sr1e, sr1o, g1m, g1t, gamma1, beta1,
            w2b, b2l, sl2e, sl2o, sr2e, sr2o, g2m, g2t, gamma2, beta2,
            wfc, beff)

    flops = n * 2 * (5 * 24 * 28 * 24 * c1          # conv1 matmuls
                     + 2 * 24 * 24 * c1 * 12 * c1   # pool1 col selection
                     + 2 * 12 * 24 * 12 * c1        # pool1 row selection
                     + 5 * 8 * 12 * c1 * 8 * c2     # conv2 matmuls
                     + 2 * 8 * 8 * c2 * 4 * c2      # pool2 col selection
                     + 2 * 4 * 8 * 4 * c2           # pool2 row selection
                     + 4 * 4 * c2 * 10)             # collapsed FC
    bytes_accessed = sum(int(np.prod(a.shape)) * 4 for a in args) + n * 10 * 4

    return pl.pallas_call(
        _lenet_kernel,
        out_shape=jax.ShapeDtypeStruct((n, 10), f32),
        in_specs=[pl.BlockSpec(memory_space=pltpu.MemorySpace.VMEM)] * len(args),
        out_specs=pl.BlockSpec(memory_space=pltpu.MemorySpace.VMEM),
        compiler_params=pltpu.CompilerParams(vmem_limit_bytes=32 * 1024 * 1024),
        cost_estimate=pl.CostEstimate(flops=int(flops),
                                      transcendentals=int(c1 + c2),
                                      bytes_accessed=int(bytes_accessed)),
    )(*args)


# ---------------------------------------------------------------------------
# Pure-JAX reference (PyTorch op-for-op, training-mode BatchNorm)
# ---------------------------------------------------------------------------

def lenet_reference(x, p):
    def conv(x, w, b):
        y = jax.lax.conv_general_dilated(
            x, w, (1, 1), "VALID", dimension_numbers=("NCHW", "OIHW", "NCHW"))
        return y + b[None, :, None, None]

    def pool(x):
        return jax.lax.reduce_window(
            x, -jnp.inf, jax.lax.max, (1, 1, 2, 2), (1, 1, 2, 2), "VALID")

    def bn(x, g, b):
        mean = x.mean(axis=(0, 2, 3), keepdims=True)
        var = ((x - mean) ** 2).mean(axis=(0, 2, 3), keepdims=True)
        return ((x - mean) * jax.lax.rsqrt(var + BN_EPS)
                * g[None, :, None, None] + b[None, :, None, None])

    h = bn(jax.nn.relu(pool(conv(x, p["w1"], p["b1"]))), p["g1"], p["be1"])
    h = bn(jax.nn.relu(pool(conv(h, p["w2"], p["b2"]))), p["g2"], p["be2"])
    h = h.reshape(x.shape[0], -1)
    h = h @ p["w5"].T + p["b5"]
    h = h @ p["w6"].T + p["b6"]
    return h @ p["w7"].T + p["b7"]


if __name__ == "__main__":
    # Lenet(nodesNum1=4, nodesNum2=8, nodesFc1=32, nodesFc2=16); the
    # Linear(nodesNum2*4*4, .) layer implies MNIST-sized 28x28x1 input.
    N, C1, C2, FC1, FC2 = 2, 4, 8, 32, 16

    key = jax.random.PRNGKey(0)
    keys = jax.random.split(key, 16)

    def rnd(k, shape, scale=0.1):
        return scale * jax.random.normal(k, shape, dtype=jnp.float32)

    params = {
        "w1": rnd(keys[0], (C1, 1, 5, 5)),
        "b1": rnd(keys[1], (C1,)),
        "g1": 1.0 + rnd(keys[2], (C1,)),
        "be1": rnd(keys[3], (C1,)),
        "w2": rnd(keys[4], (C2, C1, 5, 5)),
        "b2": rnd(keys[5], (C2,)),
        "g2": 1.0 + rnd(keys[6], (C2,)),
        "be2": rnd(keys[7], (C2,)),
        "w5": rnd(keys[8], (FC1, C2 * 4 * 4)),
        "b5": rnd(keys[9], (FC1,)),
        "w6": rnd(keys[10], (FC2, FC1)),
        "b6": rnd(keys[11], (FC2,)),
        "w7": rnd(keys[12], (10, FC2)),
        "b7": rnd(keys[13], (10,)),
    }
    x = jax.random.normal(keys[14], (N, 1, 28, 28), dtype=jnp.float32)

    out = jax.block_until_ready(jax.jit(lenet_forward)(x, params))
    ref = jax.block_until_ready(lenet_reference(x, params))

    assert out.shape == (N, 10), out.shape
    assert jnp.allclose(out, ref, atol=2e-3, rtol=2e-3), (
        "max abs err", float(jnp.max(jnp.abs(out - ref))))
    print("KERNEL_OK")
</pallas_src>

<mosaic_0001>
module attributes {stable_mosaic.version = 11 : i64} {
  func.func @_lenet_kernel(%arg0: memref<2x28x28xf32, #tpu.memory_space<vmem>>, %arg1: memref<5x28x96xf32, #tpu.memory_space<vmem>>, %arg2: memref<1x96xf32, #tpu.memory_space<vmem>>, %arg3: memref<96x48xf32, #tpu.memory_space<vmem>>, %arg4: memref<96x48xf32, #tpu.memory_space<vmem>>, %arg5: memref<12x24xf32, #tpu.memory_space<vmem>>, %arg6: memref<12x24xf32, #tpu.memory_space<vmem>>, %arg7: memref<48x4xf32, #tpu.memory_space<vmem>>, %arg8: memref<4x48xf32, #tpu.memory_space<vmem>>, %arg9: memref<1x4xf32, #tpu.memory_space<vmem>>, %arg10: memref<1x4xf32, #tpu.memory_space<vmem>>, %arg11: memref<5x48x64xf32, #tpu.memory_space<vmem>>, %arg12: memref<1x64xf32, #tpu.memory_space<vmem>>, %arg13: memref<64x32xf32, #tpu.memory_space<vmem>>, %arg14: memref<64x32xf32, #tpu.memory_space<vmem>>, %arg15: memref<4x8xf32, #tpu.memory_space<vmem>>, %arg16: memref<4x8xf32, #tpu.memory_space<vmem>>, %arg17: memref<32x8xf32, #tpu.memory_space<vmem>>, %arg18: memref<8x32xf32, #tpu.memory_space<vmem>>, %arg19: memref<1x8xf32, #tpu.memory_space<vmem>>, %arg20: memref<1x8xf32, #tpu.memory_space<vmem>>, %arg21: memref<4x32x10xf32, #tpu.memory_space<vmem>>, %arg22: memref<1x10xf32, #tpu.memory_space<vmem>>, %arg23: memref<2x10xf32, #tpu.memory_space<vmem>>) attributes {dimension_semantics = [], scalar_prefetch = 0 : i64, scratch_operands = 0 : i64, tpu.core_type = #tpu.core_type<tc>} {
    %c0 = arith.constant 0 : index
    %c0_0 = arith.constant 0 : index
    %0 = vector.load %arg2[%c0, %c0_0] : memref<1x96xf32, #tpu.memory_space<vmem>>, vector<1x96xf32>
    %c0_1 = arith.constant 0 : index
    %c0_2 = arith.constant 0 : index
    %1 = vector.load %arg3[%c0_1, %c0_2] : memref<96x48xf32, #tpu.memory_space<vmem>>, vector<96x48xf32>
    %c0_3 = arith.constant 0 : index
    %c0_4 = arith.constant 0 : index
    %2 = vector.load %arg4[%c0_3, %c0_4] : memref<96x48xf32, #tpu.memory_space<vmem>>, vector<96x48xf32>
    %c0_5 = arith.constant 0 : index
    %c0_6 = arith.constant 0 : index
    %3 = vector.load %arg5[%c0_5, %c0_6] : memref<12x24xf32, #tpu.memory_space<vmem>>, vector<12x24xf32>
    %c0_7 = arith.constant 0 : index
    %c0_8 = arith.constant 0 : index
    %4 = vector.load %arg6[%c0_7, %c0_8] : memref<12x24xf32, #tpu.memory_space<vmem>>, vector<12x24xf32>
    %c0_9 = arith.constant 0 : index
    %c0_10 = arith.constant 0 : index
    %c0_11 = arith.constant 0 : index
    %5 = vector.load %arg0[%c0_9, %c0_10, %c0_11] : memref<2x28x28xf32, #tpu.memory_space<vmem>>, vector<1x28x28xf32>
    %6 = vector.shape_cast %5 : vector<1x28x28xf32> to vector<28x28xf32>
    %7 = vector.extract_strided_slice %6 {offsets = [0, 0], sizes = [24, 28], strides = [1, 1]} : vector<28x28xf32> to vector<24x28xf32>
    %c0_12 = arith.constant 0 : index
    %c0_13 = arith.constant 0 : index
    %c0_14 = arith.constant 0 : index
    %8 = vector.load %arg1[%c0_12, %c0_13, %c0_14] : memref<5x28x96xf32, #tpu.memory_space<vmem>>, vector<1x28x96xf32>
    %9 = vector.shape_cast %8 : vector<1x28x96xf32> to vector<28x96xf32>
    %cst = arith.constant dense<0.000000e+00> : vector<24x96xf32>
    %10 = tpu.matmul %7, %9, %cst {dimension_numbers = #tpu.dot_dimension_numbers<[1], [0], [0], [1], [0, 0, 1, 1], [], []>} : vector<24x28xf32>, vector<28x96xf32>, vector<24x96xf32> -> vector<24x96xf32>
    %11 = vector.extract_strided_slice %6 {offsets = [1, 0], sizes = [24, 28], strides = [1, 1]} : vector<28x28xf32> to vector<24x28xf32>
    %c1 = arith.constant 1 : index
    %c0_15 = arith.constant 0 : index
    %c0_16 = arith.constant 0 : index
    %12 = vector.load %arg1[%c1, %c0_15, %c0_16] : memref<5x28x96xf32, #tpu.memory_space<vmem>>, vector<1x28x96xf32>
    %13 = vector.shape_cast %12 : vector<1x28x96xf32> to vector<28x96xf32>
    %cst_17 = arith.constant dense<0.000000e+00> : vector<24x96xf32>
    %14 = tpu.matmul %11, %13, %cst_17 {dimension_numbers = #tpu.dot_dimension_numbers<[1], [0], [0], [1], [0, 0, 1, 1], [], []>} : vector<24x28xf32>, vector<28x96xf32>, vector<24x96xf32> -> vector<24x96xf32>
    %15 = arith.addf %10, %14 : vector<24x96xf32>
    %16 = vector.extract_strided_slice %6 {offsets = [2, 0], sizes = [24, 28], strides = [1, 1]} : vector<28x28xf32> to vector<24x28xf32>
    %c2 = arith.constant 2 : index
    %c0_18 = arith.constant 0 : index
    %c0_19 = arith.constant 0 : index
    %17 = vector.load %arg1[%c2, %c0_18, %c0_19] : memref<5x28x96xf32, #tpu.memory_space<vmem>>, vector<1x28x96xf32>
    %18 = vector.shape_cast %17 : vector<1x28x96xf32> to vector<28x96xf32>
    %cst_20 = arith.constant dense<0.000000e+00> : vector<24x96xf32>
    %19 = tpu.matmul %16, %18, %cst_20 {dimension_numbers = #tpu.dot_dimension_numbers<[1], [0], [0], [1], [0, 0, 1, 1], [], []>} : vector<24x28xf32>, vector<28x96xf32>, vector<24x96xf32> -> vector<24x96xf32>
    %20 = arith.addf %15, %19 : vector<24x96xf32>
    %21 = vector.extract_strided_slice %6 {offsets = [3, 0], sizes = [24, 28], strides = [1, 1]} : vector<28x28xf32> to vector<24x28xf32>
    %c3 = arith.constant 3 : index
    %c0_21 = arith.constant 0 : index
    %c0_22 = arith.constant 0 : index
    %22 = vector.load %arg1[%c3, %c0_21, %c0_22] : memref<5x28x96xf32, #tpu.memory_space<vmem>>, vector<1x28x96xf32>
    %23 = vector.shape_cast %22 : vector<1x28x96xf32> to vector<28x96xf32>
    %cst_23 = arith.constant dense<0.000000e+00> : vector<24x96xf32>
    %24 = tpu.matmul %21, %23, %cst_23 {dimension_numbers = #tpu.dot_dimension_numbers<[1], [0], [0], [1], [0, 0, 1, 1], [], []>} : vector<24x28xf32>, vector<28x96xf32>, vector<24x96xf32> -> vector<24x96xf32>
    %25 = arith.addf %20, %24 : vector<24x96xf32>
    %26 = vector.extract_strided_slice %6 {offsets = [4, 0], sizes = [24, 28], strides = [1, 1]} : vector<28x28xf32> to vector<24x28xf32>
    %c4 = arith.constant 4 : index
    %c0_24 = arith.constant 0 : index
    %c0_25 = arith.constant 0 : index
    %27 = vector.load %arg1[%c4, %c0_24, %c0_25] : memref<5x28x96xf32, #tpu.memory_space<vmem>>, vector<1x28x96xf32>
    %28 = vector.shape_cast %27 : vector<1x28x96xf32> to vector<28x96xf32>
    %cst_26 = arith.constant dense<0.000000e+00> : vector<24x96xf32>
    %29 = tpu.matmul %26, %28, %cst_26 {dimension_numbers = #tpu.dot_dimension_numbers<[1], [0], [0], [1], [0, 0, 1, 1], [], []>} : vector<24x28xf32>, vector<28x96xf32>, vector<24x96xf32> -> vector<24x96xf32>
    %30 = arith.addf %25, %29 : vector<24x96xf32>
    %31 = vector.broadcast %0 : vector<1x96xf32> to vector<24x96xf32>
    %32 = arith.addf %30, %31 : vector<24x96xf32>
    %cst_27 = arith.constant dense<0.000000e+00> : vector<24x48xf32>
    %33 = tpu.matmul %32, %1, %cst_27 {dimension_numbers = #tpu.dot_dimension_numbers<[1], [0], [0], [1], [0, 0, 1, 1], [], []>} : vector<24x96xf32>, vector<96x48xf32>, vector<24x48xf32> -> vector<24x48xf32>
    %cst_28 = arith.constant dense<0.000000e+00> : vector<24x48xf32>
    %34 = tpu.matmul %32, %2, %cst_28 {dimension_numbers = #tpu.dot_dimension_numbers<[1], [0], [0], [1], [0, 0, 1, 1], [], []>} : vector<24x96xf32>, vector<96x48xf32>, vector<24x48xf32> -> vector<24x48xf32>
    %35 = arith.maximumf %33, %34 : vector<24x48xf32>
    %cst_29 = arith.constant dense<0.000000e+00> : vector<12x48xf32>
    %36 = tpu.matmul %3, %35, %cst_29 {dimension_numbers = #tpu.dot_dimension_numbers<[1], [0], [0], [1], [0, 0, 1, 1], [], []>} : vector<12x24xf32>, vector<24x48xf32>, vector<12x48xf32> -> vector<12x48xf32>
    %cst_30 = arith.constant dense<0.000000e+00> : vector<12x48xf32>
    %37 = tpu.matmul %4, %35, %cst_30 {dimension_numbers = #tpu.dot_dimension_numbers<[1], [0], [0], [1], [0, 0, 1, 1], [], []>} : vector<12x24xf32>, vector<24x48xf32>, vector<12x48xf32> -> vector<12x48xf32>
    %38 = arith.maximumf %36, %37 : vector<12x48xf32>
    %cst_31 = arith.constant 0.000000e+00 : f32
    %39 = vector.broadcast %cst_31 : f32 to vector<12x48xf32>
    %40 = arith.maximumf %38, %39 : vector<12x48xf32>
    %c1_32 = arith.constant 1 : index
    %c0_33 = arith.constant 0 : index
    %c0_34 = arith.constant 0 : index
    %41 = vector.load %arg0[%c1_32, %c0_33, %c0_34] : memref<2x28x28xf32, #tpu.memory_space<vmem>>, vector<1x28x28xf32>
    %42 = vector.shape_cast %41 : vector<1x28x28xf32> to vector<28x28xf32>
    %43 = vector.extract_strided_slice %42 {offsets = [0, 0], sizes = [24, 28], strides = [1, 1]} : vector<28x28xf32> to vector<24x28xf32>
    %c0_35 = arith.constant 0 : index
    %c0_36 = arith.constant 0 : index
    %c0_37 = arith.constant 0 : index
    %44 = vector.load %arg1[%c0_35, %c0_36, %c0_37] : memref<5x28x96xf32, #tpu.memory_space<vmem>>, vector<1x28x96xf32>
    %45 = vector.shape_cast %44 : vector<1x28x96xf32> to vector<28x96xf32>
    %cst_38 = arith.constant dense<0.000000e+00> : vector<24x96xf32>
    %46 = tpu.matmul %43, %45, %cst_38 {dimension_numbers = #tpu.dot_dimension_numbers<[1], [0], [0], [1], [0, 0, 1, 1], [], []>} : vector<24x28xf32>, vector<28x96xf32>, vector<24x96xf32> -> vector<24x96xf32>
    %47 = vector.extract_strided_slice %42 {offsets = [1, 0], sizes = [24, 28], strides = [1, 1]} : vector<28x28xf32> to vector<24x28xf32>
    %c1_39 = arith.constant 1 : index
    %c0_40 = arith.constant 0 : index
    %c0_41 = arith.constant 0 : index
    %48 = vector.load %arg1[%c1_39, %c0_40, %c0_41] : memref<5x28x96xf32, #tpu.memory_space<vmem>>, vector<1x28x96xf32>
    %49 = vector.shape_cast %48 : vector<1x28x96xf32> to vector<28x96xf32>
    %cst_42 = arith.constant dense<0.000000e+00> : vector<24x96xf32>
    %50 = tpu.matmul %47, %49, %cst_42 {dimension_numbers = #tpu.dot_dimension_numbers<[1], [0], [0], [1], [0, 0, 1, 1], [], []>} : vector<24x28xf32>, vector<28x96xf32>, vector<24x96xf32> -> vector<24x96xf32>
    %51 = arith.addf %46, %50 : vector<24x96xf32>
    %52 = vector.extract_strided_slice %42 {offsets = [2, 0], sizes = [24, 28], strides = [1, 1]} : vector<28x28xf32> to vector<24x28xf32>
    %c2_43 = arith.constant 2 : index
    %c0_44 = arith.constant 0 : index
    %c0_45 = arith.constant 0 : index
    %53 = vector.load %arg1[%c2_43, %c0_44, %c0_45] : memref<5x28x96xf32, #tpu.memory_space<vmem>>, vector<1x28x96xf32>
    %54 = vector.shape_cast %53 : vector<1x28x96xf32> to vector<28x96xf32>
    %cst_46 = arith.constant dense<0.000000e+00> : vector<24x96xf32>
    %55 = tpu.matmul %52, %54, %cst_46 {dimension_numbers = #tpu.dot_dimension_numbers<[1], [0], [0], [1], [0, 0, 1, 1], [], []>} : vector<24x28xf32>, vector<28x96xf32>, vector<24x96xf32> -> vector<24x96xf32>
    %56 = arith.addf %51, %55 : vector<24x96xf32>
    %57 = vector.extract_strided_slice %42 {offsets = [3, 0], sizes = [24, 28], strides = [1, 1]} : vector<28x28xf32> to vector<24x28xf32>
    %c3_47 = arith.constant 3 : index
    %c0_48 = arith.constant 0 : index
    %c0_49 = arith.constant 0 : index
    %58 = vector.load %arg1[%c3_47, %c0_48, %c0_49] : memref<5x28x96xf32, #tpu.memory_space<vmem>>, vector<1x28x96xf32>
    %59 = vector.shape_cast %58 : vector<1x28x96xf32> to vector<28x96xf32>
    %cst_50 = arith.constant dense<0.000000e+00> : vector<24x96xf32>
    %60 = tpu.matmul %57, %59, %cst_50 {dimension_numbers = #tpu.dot_dimension_numbers<[1], [0], [0], [1], [0, 0, 1, 1], [], []>} : vector<24x28xf32>, vector<28x96xf32>, vector<24x96xf32> -> vector<24x96xf32>
    %61 = arith.addf %56, %60 : vector<24x96xf32>
    %62 = vector.extract_strided_slice %42 {offsets = [4, 0], sizes = [24, 28], strides = [1, 1]} : vector<28x28xf32> to vector<24x28xf32>
    %c4_51 = arith.constant 4 : index
    %c0_52 = arith.constant 0 : index
    %c0_53 = arith.constant 0 : index
    %63 = vector.load %arg1[%c4_51, %c0_52, %c0_53] : memref<5x28x96xf32, #tpu.memory_space<vmem>>, vector<1x28x96xf32>
    %64 = vector.shape_cast %63 : vector<1x28x96xf32> to vector<28x96xf32>
    %cst_54 = arith.constant dense<0.000000e+00> : vector<24x96xf32>
    %65 = tpu.matmul %62, %64, %cst_54 {dimension_numbers = #tpu.dot_dimension_numbers<[1], [0], [0], [1], [0, 0, 1, 1], [], []>} : vector<24x28xf32>, vector<28x96xf32>, vector<24x96xf32> -> vector<24x96xf32>
    %66 = arith.addf %61, %65 : vector<24x96xf32>
    %67 = vector.broadcast %0 : vector<1x96xf32> to vector<24x96xf32>
    %68 = arith.addf %66, %67 : vector<24x96xf32>
    %cst_55 = arith.constant dense<0.000000e+00> : vector<24x48xf32>
    %69 = tpu.matmul %68, %1, %cst_55 {dimension_numbers = #tpu.dot_dimension_numbers<[1], [0], [0], [1], [0, 0, 1, 1], [], []>} : vector<24x96xf32>, vector<96x48xf32>, vector<24x48xf32> -> vector<24x48xf32>
    %cst_56 = arith.constant dense<0.000000e+00> : vector<24x48xf32>
    %70 = tpu.matmul %68, %2, %cst_56 {dimension_numbers = #tpu.dot_dimension_numbers<[1], [0], [0], [1], [0, 0, 1, 1], [], []>} : vector<24x96xf32>, vector<96x48xf32>, vector<24x48xf32> -> vector<24x48xf32>
    %71 = arith.maximumf %69, %70 : vector<24x48xf32>
    %cst_57 = arith.constant dense<0.000000e+00> : vector<12x48xf32>
    %72 = tpu.matmul %3, %71, %cst_57 {dimension_numbers = #tpu.dot_dimension_numbers<[1], [0], [0], [1], [0, 0, 1, 1], [], []>} : vector<12x24xf32>, vector<24x48xf32>, vector<12x48xf32> -> vector<12x48xf32>
    %cst_58 = arith.constant dense<0.000000e+00> : vector<12x48xf32>
    %73 = tpu.matmul %4, %71, %cst_58 {dimension_numbers = #tpu.dot_dimension_numbers<[1], [0], [0], [1], [0, 0, 1, 1], [], []>} : vector<12x24xf32>, vector<24x48xf32>, vector<12x48xf32> -> vector<12x48xf32>
    %74 = arith.maximumf %72, %73 : vector<12x48xf32>
    %cst_59 = arith.constant 0.000000e+00 : f32
    %75 = vector.broadcast %cst_59 : f32 to vector<12x48xf32>
    %76 = arith.maximumf %74, %75 : vector<12x48xf32>
    %c0_60 = arith.constant 0 : index
    %c0_61 = arith.constant 0 : index
    %77 = vector.load %arg7[%c0_60, %c0_61] : memref<48x4xf32, #tpu.memory_space<vmem>>, vector<48x4xf32>
    %c0_62 = arith.constant 0 : index
    %c0_63 = arith.constant 0 : index
    %78 = vector.load %arg8[%c0_62, %c0_63] : memref<4x48xf32, #tpu.memory_space<vmem>>, vector<4x48xf32>
    %c0_64 = arith.constant 0 : index
    %c0_65 = arith.constant 0 : index
    %79 = vector.load %arg9[%c0_64, %c0_65] : memref<1x4xf32, #tpu.memory_space<vmem>>, vector<1x4xf32>
    %c0_66 = arith.constant 0 : index
    %c0_67 = arith.constant 0 : index
    %80 = vector.load %arg10[%c0_66, %c0_67] : memref<1x4xf32, #tpu.memory_space<vmem>>, vector<1x4xf32>
    %cst_68 = arith.constant dense<0.000000e+00> : vector<48xf32>
    %81 = vector.multi_reduction <add>, %40, %cst_68 [0] : vector<12x48xf32> to vector<48xf32>
    %82 = vector.shape_cast %81 : vector<48xf32> to vector<1x48xf32>
    %83 = arith.mulf %40, %40 : vector<12x48xf32>
    %cst_69 = arith.constant dense<0.000000e+00> : vector<48xf32>
    %84 = vector.multi_reduction <add>, %83, %cst_69 [0] : vector<12x48xf32> to vector<48xf32>
    %85 = vector.shape_cast %84 : vector<48xf32> to vector<1x48xf32>
    %cst_70 = arith.constant dense<0.000000e+00> : vector<48xf32>
    %86 = vector.multi_reduction <add>, %76, %cst_70 [0] : vector<12x48xf32> to vector<48xf32>
    %87 = vector.shape_cast %86 : vector<48xf32> to vector<1x48xf32>
    %88 = arith.addf %82, %87 : vector<1x48xf32>
    %89 = arith.mulf %76, %76 : vector<12x48xf32>
    %cst_71 = arith.constant dense<0.000000e+00> : vector<48xf32>
    %90 = vector.multi_reduction <add>, %89, %cst_71 [0] : vector<12x48xf32> to vector<48xf32>
    %91 = vector.shape_cast %90 : vector<48xf32> to vector<1x48xf32>
    %92 = arith.addf %85, %91 : vector<1x48xf32>
    %cst_72 = arith.constant dense<0.000000e+00> : vector<1x4xf32>
    %93 = tpu.matmul %88, %77, %cst_72 {dimension_numbers = #tpu.dot_dimension_numbers<[1], [0], [0], [1], [0, 0, 1, 1], [], []>} : vector<1x48xf32>, vector<48x4xf32>, vector<1x4xf32> -> vector<1x4xf32>
    %cst_73 = arith.constant 0.00347222225 : f32
    %94 = vector.broadcast %cst_73 : f32 to vector<1x4xf32>
    %95 = arith.mulf %93, %94 : vector<1x4xf32>
    %cst_74 = arith.constant dense<0.000000e+00> : vector<1x4xf32>
    %96 = tpu.matmul %92, %77, %cst_74 {dimension_numbers = #tpu.dot_dimension_numbers<[1], [0], [0], [1], [0, 0, 1, 1], [], []>} : vector<1x48xf32>, vector<48x4xf32>, vector<1x4xf32> -> vector<1x4xf32>
    %cst_75 = arith.constant 0.00347222225 : f32
    %97 = vector.broadcast %cst_75 : f32 to vector<1x4xf32>
    %98 = arith.mulf %96, %97 : vector<1x4xf32>
    %99 = arith.mulf %95, %95 : vector<1x4xf32>
    %100 = arith.subf %98, %99 : vector<1x4xf32>
    %cst_76 = arith.constant 9.99999974E-6 : f32
    %101 = vector.broadcast %cst_76 : f32 to vector<1x4xf32>
    %102 = arith.addf %100, %101 : vector<1x4xf32>
    %103 = math.rsqrt %102 : vector<1x4xf32>
    %104 = arith.mulf %79, %103 : vector<1x4xf32>
    %105 = arith.mulf %95, %104 : vector<1x4xf32>
    %106 = arith.subf %80, %105 : vector<1x4xf32>
    %cst_77 = arith.constant dense<0.000000e+00> : vector<1x48xf32>
    %107 = tpu.matmul %104, %78, %cst_77 {dimension_numbers = #tpu.dot_dimension_numbers<[1], [0], [0], [1], [0, 0, 1, 1], [], []>} : vector<1x4xf32>, vector<4x48xf32>, vector<1x48xf32> -> vector<1x48xf32>
    %cst_78 = arith.constant dense<0.000000e+00> : vector<1x48xf32>
    %108 = tpu.matmul %106, %78, %cst_78 {dimension_numbers = #tpu.dot_dimension_numbers<[1], [0], [0], [1], [0, 0, 1, 1], [], []>} : vector<1x4xf32>, vector<4x48xf32>, vector<1x48xf32> -> vector<1x48xf32>
    %109 = vector.broadcast %107 : vector<1x48xf32> to vector<12x48xf32>
    %110 = arith.mulf %40, %109 : vector<12x48xf32>
    %111 = vector.broadcast %108 : vector<1x48xf32> to vector<12x48xf32>
    %112 = arith.addf %110, %111 : vector<12x48xf32>
    %113 = vector.broadcast %107 : vector<1x48xf32> to vector<12x48xf32>
    %114 = arith.mulf %76, %113 : vector<12x48xf32>
    %115 = vector.broadcast %108 : vector<1x48xf32> to vector<12x48xf32>
    %116 = arith.addf %114, %115 : vector<12x48xf32>
    %c0_79 = arith.constant 0 : index
    %c0_80 = arith.constant 0 : index
    %117 = vector.load %arg12[%c0_79, %c0_80] : memref<1x64xf32, #tpu.memory_space<vmem>>, vector<1x64xf32>
    %c0_81 = arith.constant 0 : index
    %c0_82 = arith.constant 0 : index
    %118 = vector.load %arg13[%c0_81, %c0_82] : memref<64x32xf32, #tpu.memory_space<vmem>>, vector<64x32xf32>
    %c0_83 = arith.constant 0 : index
    %c0_84 = arith.constant 0 : index
    %119 = vector.load %arg14[%c0_83, %c0_84] : memref<64x32xf32, #tpu.memory_space<vmem>>, vector<64x32xf32>
    %c0_85 = arith.constant 0 : index
    %c0_86 = arith.constant 0 : index
    %120 = vector.load %arg15[%c0_85, %c0_86] : memref<4x8xf32, #tpu.memory_space<vmem>>, vector<4x8xf32>
    %c0_87 = arith.constant 0 : index
    %c0_88 = arith.constant 0 : index
    %121 = vector.load %arg16[%c0_87, %c0_88] : memref<4x8xf32, #tpu.memory_space<vmem>>, vector<4x8xf32>
    %122 = vector.extract_strided_slice %112 {offsets = [0, 0], sizes = [8, 48], strides = [1, 1]} : vector<12x48xf32> to vector<8x48xf32>
    %c0_89 = arith.constant 0 : index
    %c0_90 = arith.constant 0 : index
    %c0_91 = arith.constant 0 : index
    %123 = vector.load %arg11[%c0_89, %c0_90, %c0_91] : memref<5x48x64xf32, #tpu.memory_space<vmem>>, vector<1x48x64xf32>
    %124 = vector.shape_cast %123 : vector<1x48x64xf32> to vector<48x64xf32>
    %cst_92 = arith.constant dense<0.000000e+00> : vector<8x64xf32>
    %125 = tpu.matmul %122, %124, %cst_92 {dimension_numbers = #tpu.dot_dimension_numbers<[1], [0], [0], [1], [0, 0, 1, 1], [], []>} : vector<8x48xf32>, vector<48x64xf32>, vector<8x64xf32> -> vector<8x64xf32>
    %126 = vector.extract_strided_slice %112 {offsets = [1, 0], sizes = [8, 48], strides = [1, 1]} : vector<12x48xf32> to vector<8x48xf32>
    %c1_93 = arith.constant 1 : index
    %c0_94 = arith.constant 0 : index
    %c0_95 = arith.constant 0 : index
    %127 = vector.load %arg11[%c1_93, %c0_94, %c0_95] : memref<5x48x64xf32, #tpu.memory_space<vmem>>, vector<1x48x64xf32>
    %128 = vector.shape_cast %127 : vector<1x48x64xf32> to vector<48x64xf32>
    %cst_96 = arith.constant dense<0.000000e+00> : vector<8x64xf32>
    %129 = tpu.matmul %126, %128, %cst_96 {dimension_numbers = #tpu.dot_dimension_numbers<[1], [0], [0], [1], [0, 0, 1, 1], [], []>} : vector<8x48xf32>, vector<48x64xf32>, vector<8x64xf32> -> vector<8x64xf32>
    %130 = arith.addf %125, %129 : vector<8x64xf32>
    %131 = vector.extract_strided_slice %112 {offsets = [2, 0], sizes = [8, 48], strides = [1, 1]} : vector<12x48xf32> to vector<8x48xf32>
    %c2_97 = arith.constant 2 : index
    %c0_98 = arith.constant 0 : index
    %c0_99 = arith.constant 0 : index
    %132 = vector.load %arg11[%c2_97, %c0_98, %c0_99] : memref<5x48x64xf32, #tpu.memory_space<vmem>>, vector<1x48x64xf32>
    %133 = vector.shape_cast %132 : vector<1x48x64xf32> to vector<48x64xf32>
    %cst_100 = arith.constant dense<0.000000e+00> : vector<8x64xf32>
    %134 = tpu.matmul %131, %133, %cst_100 {dimension_numbers = #tpu.dot_dimension_numbers<[1], [0], [0], [1], [0, 0, 1, 1], [], []>} : vector<8x48xf32>, vector<48x64xf32>, vector<8x64xf32> -> vector<8x64xf32>
    %135 = arith.addf %130, %134 : vector<8x64xf32>
    %136 = vector.extract_strided_slice %112 {offsets = [3, 0], sizes = [8, 48], strides = [1, 1]} : vector<12x48xf32> to vector<8x48xf32>
    %c3_101 = arith.constant 3 : index
    %c0_102 = arith.constant 0 : index
    %c0_103 = arith.constant 0 : index
    %137 = vector.load %arg11[%c3_101, %c0_102, %c0_103] : memref<5x48x64xf32, #tpu.memory_space<vmem>>, vector<1x48x64xf32>
    %138 = vector.shape_cast %137 : vector<1x48x64xf32> to vector<48x64xf32>
    %cst_104 = arith.constant dense<0.000000e+00> : vector<8x64xf32>
    %139 = tpu.matmul %136, %138, %cst_104 {dimension_numbers = #tpu.dot_dimension_numbers<[1], [0], [0], [1], [0, 0, 1, 1], [], []>} : vector<8x48xf32>, vector<48x64xf32>, vector<8x64xf32> -> vector<8x64xf32>
    %140 = arith.addf %135, %139 : vector<8x64xf32>
    %141 = vector.extract_strided_slice %112 {offsets = [4, 0], sizes = [8, 48], strides = [1, 1]} : vector<12x48xf32> to vector<8x48xf32>
    %c4_105 = arith.constant 4 : index
    %c0_106 = arith.constant 0 : index
    %c0_107 = arith.constant 0 : index
    %142 = vector.load %arg11[%c4_105, %c0_106, %c0_107] : memref<5x48x64xf32, #tpu.memory_space<vmem>>, vector<1x48x64xf32>
    %143 = vector.shape_cast %142 : vector<1x48x64xf32> to vector<48x64xf32>
    %cst_108 = arith.constant dense<0.000000e+00> : vector<8x64xf32>
    %144 = tpu.matmul %141, %143, %cst_108 {dimension_numbers = #tpu.dot_dimension_numbers<[1], [0], [0], [1], [0, 0, 1, 1], [], []>} : vector<8x48xf32>, vector<48x64xf32>, vector<8x64xf32> -> vector<8x64xf32>
    %145 = arith.addf %140, %144 : vector<8x64xf32>
    %146 = vector.broadcast %117 : vector<1x64xf32> to vector<8x64xf32>
    %147 = arith.addf %145, %146 : vector<8x64xf32>
    %cst_109 = arith.constant dense<0.000000e+00> : vector<8x32xf32>
    %148 = tpu.matmul %147, %118, %cst_109 {dimension_numbers = #tpu.dot_dimension_numbers<[1], [0], [0], [1], [0, 0, 1, 1], [], []>} : vector<8x64xf32>, vector<64x32xf32>, vector<8x32xf32> -> vector<8x32xf32>
    %cst_110 = arith.constant dense<0.000000e+00> : vector<8x32xf32>
    %149 = tpu.matmul %147, %119, %cst_110 {dimension_numbers = #tpu.dot_dimension_numbers<[1], [0], [0], [1], [0, 0, 1, 1], [], []>} : vector<8x64xf32>, vector<64x32xf32>, vector<8x32xf32> -> vector<8x32xf32>
    %150 = arith.maximumf %148, %149 : vector<8x32xf32>
    %cst_111 = arith.constant dense<0.000000e+00> : vector<4x32xf32>
    %151 = tpu.matmul %120, %150, %cst_111 {dimension_numbers = #tpu.dot_dimension_numbers<[1], [0], [0], [1], [0, 0, 1, 1], [], []>} : vector<4x8xf32>, vector<8x32xf32>, vector<4x32xf32> -> vector<4x32xf32>
    %cst_112 = arith.constant dense<0.000000e+00> : vector<4x32xf32>
    %152 = tpu.matmul %121, %150, %cst_112 {dimension_numbers = #tpu.dot_dimension_numbers<[1], [0], [0], [1], [0, 0, 1, 1], [], []>} : vector<4x8xf32>, vector<8x32xf32>, vector<4x32xf32> -> vector<4x32xf32>
    %153 = arith.maximumf %151, %152 : vector<4x32xf32>
    %cst_113 = arith.constant 0.000000e+00 : f32
    %154 = vector.broadcast %cst_113 : f32 to vector<4x32xf32>
    %155 = arith.maximumf %153, %154 : vector<4x32xf32>
    %156 = vector.extract_strided_slice %116 {offsets = [0, 0], sizes = [8, 48], strides = [1, 1]} : vector<12x48xf32> to vector<8x48xf32>
    %c0_114 = arith.constant 0 : index
    %c0_115 = arith.constant 0 : index
    %c0_116 = arith.constant 0 : index
    %157 = vector.load %arg11[%c0_114, %c0_115, %c0_116] : memref<5x48x64xf32, #tpu.memory_space<vmem>>, vector<1x48x64xf32>
    %158 = vector.shape_cast %157 : vector<1x48x64xf32> to vector<48x64xf32>
    %cst_117 = arith.constant dense<0.000000e+00> : vector<8x64xf32>
    %159 = tpu.matmul %156, %158, %cst_117 {dimension_numbers = #tpu.dot_dimension_numbers<[1], [0], [0], [1], [0, 0, 1, 1], [], []>} : vector<8x48xf32>, vector<48x64xf32>, vector<8x64xf32> -> vector<8x64xf32>
    %160 = vector.extract_strided_slice %116 {offsets = [1, 0], sizes = [8, 48], strides = [1, 1]} : vector<12x48xf32> to vector<8x48xf32>
    %c1_118 = arith.constant 1 : index
    %c0_119 = arith.constant 0 : index
    %c0_120 = arith.constant 0 : index
    %161 = vector.load %arg11[%c1_118, %c0_119, %c0_120] : memref<5x48x64xf32, #tpu.memory_space<vmem>>, vector<1x48x64xf32>
    %162 = vector.shape_cast %161 : vector<1x48x64xf32> to vector<48x64xf32>
    %cst_121 = arith.constant dense<0.000000e+00> : vector<8x64xf32>
    %163 = tpu.matmul %160, %162, %cst_121 {dimension_numbers = #tpu.dot_dimension_numbers<[1], [0], [0], [1], [0, 0, 1, 1], [], []>} : vector<8x48xf32>, vector<48x64xf32>, vector<8x64xf32> -> vector<8x64xf32>
    %164 = arith.addf %159, %163 : vector<8x64xf32>
    %165 = vector.extract_strided_slice %116 {offsets = [2, 0], sizes = [8, 48], strides = [1, 1]} : vector<12x48xf32> to vector<8x48xf32>
    %c2_122 = arith.constant 2 : index
    %c0_123 = arith.constant 0 : index
    %c0_124 = arith.constant 0 : index
    %166 = vector.load %arg11[%c2_122, %c0_123, %c0_124] : memref<5x48x64xf32, #tpu.memory_space<vmem>>, vector<1x48x64xf32>
    %167 = vector.shape_cast %166 : vector<1x48x64xf32> to vector<48x64xf32>
    %cst_125 = arith.constant dense<0.000000e+00> : vector<8x64xf32>
    %168 = tpu.matmul %165, %167, %cst_125 {dimension_numbers = #tpu.dot_dimension_numbers<[1], [0], [0], [1], [0, 0, 1, 1], [], []>} : vector<8x48xf32>, vector<48x64xf32>, vector<8x64xf32> -> vector<8x64xf32>
    %169 = arith.addf %164, %168 : vector<8x64xf32>
    %170 = vector.extract_strided_slice %116 {offsets = [3, 0], sizes = [8, 48], strides = [1, 1]} : vector<12x48xf32> to vector<8x48xf32>
    %c3_126 = arith.constant 3 : index
    %c0_127 = arith.constant 0 : index
    %c0_128 = arith.constant 0 : index
    %171 = vector.load %arg11[%c3_126, %c0_127, %c0_128] : memref<5x48x64xf32, #tpu.memory_space<vmem>>, vector<1x48x64xf32>
    %172 = vector.shape_cast %171 : vector<1x48x64xf32> to vector<48x64xf32>
    %cst_129 = arith.constant dense<0.000000e+00> : vector<8x64xf32>
    %173 = tpu.matmul %170, %172, %cst_129 {dimension_numbers = #tpu.dot_dimension_numbers<[1], [0], [0], [1], [0, 0, 1, 1], [], []>} : vector<8x48xf32>, vector<48x64xf32>, vector<8x64xf32> -> vector<8x64xf32>
    %174 = arith.addf %169, %173 : vector<8x64xf32>
    %175 = vector.extract_strided_slice %116 {offsets = [4, 0], sizes = [8, 48], strides = [1, 1]} : vector<12x48xf32> to vector<8x48xf32>
    %c4_130 = arith.constant 4 : index
    %c0_131 = arith.constant 0 : index
    %c0_132 = arith.constant 0 : index
    %176 = vector.load %arg11[%c4_130, %c0_131, %c0_132] : memref<5x48x64xf32, #tpu.memory_space<vmem>>, vector<1x48x64xf32>
    %177 = vector.shape_cast %176 : vector<1x48x64xf32> to vector<48x64xf32>
    %cst_133 = arith.constant dense<0.000000e+00> : vector<8x64xf32>
    %178 = tpu.matmul %175, %177, %cst_133 {dimension_numbers = #tpu.dot_dimension_numbers<[1], [0], [0], [1], [0, 0, 1, 1], [], []>} : vector<8x48xf32>, vector<48x64xf32>, vector<8x64xf32> -> vector<8x64xf32>
    %179 = arith.addf %174, %178 : vector<8x64xf32>
    %180 = vector.broadcast %117 : vector<1x64xf32> to vector<8x64xf32>
    %181 = arith.addf %179, %180 : vector<8x64xf32>
    %cst_134 = arith.constant dense<0.000000e+00> : vector<8x32xf32>
    %182 = tpu.matmul %181, %118, %cst_134 {dimension_numbers = #tpu.dot_dimension_numbers<[1], [0], [0], [1], [0, 0, 1, 1], [], []>} : vector<8x64xf32>, vector<64x32xf32>, vector<8x32xf32> -> vector<8x32xf32>
    %cst_135 = arith.constant dense<0.000000e+00> : vector<8x32xf32>
    %183 = tpu.matmul %181, %119, %cst_135 {dimension_numbers = #tpu.dot_dimension_numbers<[1], [0], [0], [1], [0, 0, 1, 1], [], []>} : vector<8x64xf32>, vector<64x32xf32>, vector<8x32xf32> -> vector<8x32xf32>
    %184 = arith.maximumf %182, %183 : vector<8x32xf32>
    %cst_136 = arith.constant dense<0.000000e+00> : vector<4x32xf32>
    %185 = tpu.matmul %120, %184, %cst_136 {dimension_numbers = #tpu.dot_dimension_numbers<[1], [0], [0], [1], [0, 0, 1, 1], [], []>} : vector<4x8xf32>, vector<8x32xf32>, vector<4x32xf32> -> vector<4x32xf32>
    %cst_137 = arith.constant dense<0.000000e+00> : vector<4x32xf32>
    %186 = tpu.matmul %121, %184, %cst_137 {dimension_numbers = #tpu.dot_dimension_numbers<[1], [0], [0], [1], [0, 0, 1, 1], [], []>} : vector<4x8xf32>, vector<8x32xf32>, vector<4x32xf32> -> vector<4x32xf32>
    %187 = arith.maximumf %185, %186 : vector<4x32xf32>
    %cst_138 = arith.constant 0.000000e+00 : f32
    %188 = vector.broadcast %cst_138 : f32 to vector<4x32xf32>
    %189 = arith.maximumf %187, %188 : vector<4x32xf32>
    %c0_139 = arith.constant 0 : index
    %c0_140 = arith.constant 0 : index
    %190 = vector.load %arg17[%c0_139, %c0_140] : memref<32x8xf32, #tpu.memory_space<vmem>>, vector<32x8xf32>
    %c0_141 = arith.constant 0 : index
    %c0_142 = arith.constant 0 : index
    %191 = vector.load %arg18[%c0_141, %c0_142] : memref<8x32xf32, #tpu.memory_space<vmem>>, vector<8x32xf32>
    %c0_143 = arith.constant 0 : index
    %c0_144 = arith.constant 0 : index
    %192 = vector.load %arg19[%c0_143, %c0_144] : memref<1x8xf32, #tpu.memory_space<vmem>>, vector<1x8xf32>
    %c0_145 = arith.constant 0 : index
    %c0_146 = arith.constant 0 : index
    %193 = vector.load %arg20[%c0_145, %c0_146] : memref<1x8xf32, #tpu.memory_space<vmem>>, vector<1x8xf32>
    %cst_147 = arith.constant dense<0.000000e+00> : vector<32xf32>
    %194 = vector.multi_reduction <add>, %155, %cst_147 [0] : vector<4x32xf32> to vector<32xf32>
    %195 = vector.shape_cast %194 : vector<32xf32> to vector<1x32xf32>
    %196 = arith.mulf %155, %155 : vector<4x32xf32>
    %cst_148 = arith.constant dense<0.000000e+00> : vector<32xf32>
    %197 = vector.multi_reduction <add>, %196, %cst_148 [0] : vector<4x32xf32> to vector<32xf32>
    %198 = vector.shape_cast %197 : vector<32xf32> to vector<1x32xf32>
    %cst_149 = arith.constant dense<0.000000e+00> : vector<32xf32>
    %199 = vector.multi_reduction <add>, %189, %cst_149 [0] : vector<4x32xf32> to vector<32xf32>
    %200 = vector.shape_cast %199 : vector<32xf32> to vector<1x32xf32>
    %201 = arith.addf %195, %200 : vector<1x32xf32>
    %202 = arith.mulf %189, %189 : vector<4x32xf32>
    %cst_150 = arith.constant dense<0.000000e+00> : vector<32xf32>
    %203 = vector.multi_reduction <add>, %202, %cst_150 [0] : vector<4x32xf32> to vector<32xf32>
    %204 = vector.shape_cast %203 : vector<32xf32> to vector<1x32xf32>
    %205 = arith.addf %198, %204 : vector<1x32xf32>
    %cst_151 = arith.constant dense<0.000000e+00> : vector<1x8xf32>
    %206 = tpu.matmul %201, %190, %cst_151 {dimension_numbers = #tpu.dot_dimension_numbers<[1], [0], [0], [1], [0, 0, 1, 1], [], []>} : vector<1x32xf32>, vector<32x8xf32>, vector<1x8xf32> -> vector<1x8xf32>
    %cst_152 = arith.constant 3.125000e-02 : f32
    %207 = vector.broadcast %cst_152 : f32 to vector<1x8xf32>
    %208 = arith.mulf %206, %207 : vector<1x8xf32>
    %cst_153 = arith.constant dense<0.000000e+00> : vector<1x8xf32>
    %209 = tpu.matmul %205, %190, %cst_153 {dimension_numbers = #tpu.dot_dimension_numbers<[1], [0], [0], [1], [0, 0, 1, 1], [], []>} : vector<1x32xf32>, vector<32x8xf32>, vector<1x8xf32> -> vector<1x8xf32>
    %cst_154 = arith.constant 3.125000e-02 : f32
    %210 = vector.broadcast %cst_154 : f32 to vector<1x8xf32>
    %211 = arith.mulf %209, %210 : vector<1x8xf32>
    %212 = arith.mulf %208, %208 : vector<1x8xf32>
    %213 = arith.subf %211, %212 : vector<1x8xf32>
    %cst_155 = arith.constant 9.99999974E-6 : f32
    %214 = vector.broadcast %cst_155 : f32 to vector<1x8xf32>
    %215 = arith.addf %213, %214 : vector<1x8xf32>
    %216 = math.rsqrt %215 : vector<1x8xf32>
    %217 = arith.mulf %192, %216 : vector<1x8xf32>
    %218 = arith.mulf %208, %217 : vector<1x8xf32>
    %219 = arith.subf %193, %218 : vector<1x8xf32>
    %cst_156 = arith.constant dense<0.000000e+00> : vector<1x32xf32>
    %220 = tpu.matmul %217, %191, %cst_156 {dimension_numbers = #tpu.dot_dimension_numbers<[1], [0], [0], [1], [0, 0, 1, 1], [], []>} : vector<1x8xf32>, vector<8x32xf32>, vector<1x32xf32> -> vector<1x32xf32>
    %cst_157 = arith.constant dense<0.000000e+00> : vector<1x32xf32>
    %221 = tpu.matmul %219, %191, %cst_157 {dimension_numbers = #tpu.dot_dimension_numbers<[1], [0], [0], [1], [0, 0, 1, 1], [], []>} : vector<1x8xf32>, vector<8x32xf32>, vector<1x32xf32> -> vector<1x32xf32>
    %222 = vector.broadcast %220 : vector<1x32xf32> to vector<4x32xf32>
    %223 = arith.mulf %155, %222 : vector<4x32xf32>
    %224 = vector.broadcast %221 : vector<1x32xf32> to vector<4x32xf32>
    %225 = arith.addf %223, %224 : vector<4x32xf32>
    %226 = vector.broadcast %220 : vector<1x32xf32> to vector<4x32xf32>
    %227 = arith.mulf %189, %226 : vector<4x32xf32>
    %228 = vector.broadcast %221 : vector<1x32xf32> to vector<4x32xf32>
    %229 = arith.addf %227, %228 : vector<4x32xf32>
    %c0_158 = arith.constant 0 : index
    %c0_159 = arith.constant 0 : index
    %230 = vector.load %arg22[%c0_158, %c0_159] : memref<1x10xf32, #tpu.memory_space<vmem>>, vector<1x10xf32>
    %231 = vector.extract_strided_slice %225 {offsets = [0, 0], sizes = [1, 32], strides = [1, 1]} : vector<4x32xf32> to vector<1x32xf32>
    %c0_160 = arith.constant 0 : index
    %c0_161 = arith.constant 0 : index
    %c0_162 = arith.constant 0 : index
    %232 = vector.load %arg21[%c0_160, %c0_161, %c0_162] : memref<4x32x10xf32, #tpu.memory_space<vmem>>, vector<1x32x10xf32>
    %233 = vector.shape_cast %232 : vector<1x32x10xf32> to vector<32x10xf32>
    %cst_163 = arith.constant dense<0.000000e+00> : vector<1x10xf32>
    %234 = tpu.matmul %231, %233, %cst_163 {dimension_numbers = #tpu.dot_dimension_numbers<[1], [0], [0], [1], [0, 0, 1, 1], [], []>} : vector<1x32xf32>, vector<32x10xf32>, vector<1x10xf32> -> vector<1x10xf32>
    %235 = arith.addf %230, %234 : vector<1x10xf32>
    %236 = vector.extract_strided_slice %225 {offsets = [1, 0], sizes = [1, 32], strides = [1, 1]} : vector<4x32xf32> to vector<1x32xf32>
    %c1_164 = arith.constant 1 : index
    %c0_165 = arith.constant 0 : index
    %c0_166 = arith.constant 0 : index
    %237 = vector.load %arg21[%c1_164, %c0_165, %c0_166] : memref<4x32x10xf32, #tpu.memory_space<vmem>>, vector<1x32x10xf32>
    %238 = vector.shape_cast %237 : vector<1x32x10xf32> to vector<32x10xf32>
    %cst_167 = arith.constant dense<0.000000e+00> : vector<1x10xf32>
    %239 = tpu.matmul %236, %238, %cst_167 {dimension_numbers = #tpu.dot_dimension_numbers<[1], [0], [0], [1], [0, 0, 1, 1], [], []>} : vector<1x32xf32>, vector<32x10xf32>, vector<1x10xf32> -> vector<1x10xf32>
    %240 = arith.addf %235, %239 : vector<1x10xf32>
    %241 = vector.extract_strided_slice %225 {offsets = [2, 0], sizes = [1, 32], strides = [1, 1]} : vector<4x32xf32> to vector<1x32xf32>
    %c2_168 = arith.constant 2 : index
    %c0_169 = arith.constant 0 : index
    %c0_170 = arith.constant 0 : index
    %242 = vector.load %arg21[%c2_168, %c0_169, %c0_170] : memref<4x32x10xf32, #tpu.memory_space<vmem>>, vector<1x32x10xf32>
    %243 = vector.shape_cast %242 : vector<1x32x10xf32> to vector<32x10xf32>
    %cst_171 = arith.constant dense<0.000000e+00> : vector<1x10xf32>
    %244 = tpu.matmul %241, %243, %cst_171 {dimension_numbers = #tpu.dot_dimension_numbers<[1], [0], [0], [1], [0, 0, 1, 1], [], []>} : vector<1x32xf32>, vector<32x10xf32>, vector<1x10xf32> -> vector<1x10xf32>
    %245 = arith.addf %240, %244 : vector<1x10xf32>
    %246 = vector.extract_strided_slice %225 {offsets = [3, 0], sizes = [1, 32], strides = [1, 1]} : vector<4x32xf32> to vector<1x32xf32>
    %c3_172 = arith.constant 3 : index
    %c0_173 = arith.constant 0 : index
    %c0_174 = arith.constant 0 : index
    %247 = vector.load %arg21[%c3_172, %c0_173, %c0_174] : memref<4x32x10xf32, #tpu.memory_space<vmem>>, vector<1x32x10xf32>
    %248 = vector.shape_cast %247 : vector<1x32x10xf32> to vector<32x10xf32>
    %cst_175 = arith.constant dense<0.000000e+00> : vector<1x10xf32>
    %249 = tpu.matmul %246, %248, %cst_175 {dimension_numbers = #tpu.dot_dimension_numbers<[1], [0], [0], [1], [0, 0, 1, 1], [], []>} : vector<1x32xf32>, vector<32x10xf32>, vector<1x10xf32> -> vector<1x10xf32>
    %250 = arith.addf %245, %249 : vector<1x10xf32>
    %c0_176 = arith.constant 0 : index
    %c0_177 = arith.constant 0 : index
    %251 = vector.load %arg23[%c0_176, %c0_177] : memref<2x10xf32, #tpu.memory_space<vmem>>, vector<1x10xf32>
    tpu.vector_store %arg23[%c0_176, %c0_177], %250 {strides = array<i32>} : memref<2x10xf32, #tpu.memory_space<vmem>>, vector<1x10xf32>,
    %252 = vector.extract_strided_slice %229 {offsets = [0, 0], sizes = [1, 32], strides = [1, 1]} : vector<4x32xf32> to vector<1x32xf32>
    %c0_178 = arith.constant 0 : index
    %c0_179 = arith.constant 0 : index
    %c0_180 = arith.constant 0 : index
    %253 = vector.load %arg21[%c0_178, %c0_179, %c0_180] : memref<4x32x10xf32, #tpu.memory_space<vmem>>, vector<1x32x10xf32>
    %254 = vector.shape_cast %253 : vector<1x32x10xf32> to vector<32x10xf32>
    %cst_181 = arith.constant dense<0.000000e+00> : vector<1x10xf32>
    %255 = tpu.matmul %252, %254, %cst_181 {dimension_numbers = #tpu.dot_dimension_numbers<[1], [0], [0], [1], [0, 0, 1, 1], [], []>} : vector<1x32xf32>, vector<32x10xf32>, vector<1x10xf32> -> vector<1x10xf32>
    %256 = arith.addf %230, %255 : vector<1x10xf32>
    %257 = vector.extract_strided_slice %229 {offsets = [1, 0], sizes = [1, 32], strides = [1, 1]} : vector<4x32xf32> to vector<1x32xf32>
    %c1_182 = arith.constant 1 : index
    %c0_183 = arith.constant 0 : index
    %c0_184 = arith.constant 0 : index
    %258 = vector.load %arg21[%c1_182, %c0_183, %c0_184] : memref<4x32x10xf32, #tpu.memory_space<vmem>>, vector<1x32x10xf32>
    %259 = vector.shape_cast %258 : vector<1x32x10xf32> to vector<32x10xf32>
    %cst_185 = arith.constant dense<0.000000e+00> : vector<1x10xf32>
    %260 = tpu.matmul %257, %259, %cst_185 {dimension_numbers = #tpu.dot_dimension_numbers<[1], [0], [0], [1], [0, 0, 1, 1], [], []>} : vector<1x32xf32>, vector<32x10xf32>, vector<1x10xf32> -> vector<1x10xf32>
    %261 = arith.addf %256, %260 : vector<1x10xf32>
    %262 = vector.extract_strided_slice %229 {offsets = [2, 0], sizes = [1, 32], strides = [1, 1]} : vector<4x32xf32> to vector<1x32xf32>
    %c2_186 = arith.constant 2 : index
    %c0_187 = arith.constant 0 : index
    %c0_188 = arith.constant 0 : index
    %263 = vector.load %arg21[%c2_186, %c0_187, %c0_188] : memref<4x32x10xf32, #tpu.memory_space<vmem>>, vector<1x32x10xf32>
    %264 = vector.shape_cast %263 : vector<1x32x10xf32> to vector<32x10xf32>
    %cst_189 = arith.constant dense<0.000000e+00> : vector<1x10xf32>
    %265 = tpu.matmul %262, %264, %cst_189 {dimension_numbers = #tpu.dot_dimension_numbers<[1], [0], [0], [1], [0, 0, 1, 1], [], []>} : vector<1x32xf32>, vector<32x10xf32>, vector<1x10xf32> -> vector<1x10xf32>
    %266 = arith.addf %261, %265 : vector<1x10xf32>
    %267 = vector.extract_strided_slice %229 {offsets = [3, 0], sizes = [1, 32], strides = [1, 1]} : vector<4x32xf32> to vector<1x32xf32>
    %c3_190 = arith.constant 3 : index
    %c0_191 = arith.constant 0 : index
    %c0_192 = arith.constant 0 : index
    %268 = vector.load %arg21[%c3_190, %c0_191, %c0_192] : memref<4x32x10xf32, #tpu.memory_space<vmem>>, vector<1x32x10xf32>
    %269 = vector.shape_cast %268 : vector<1x32x10xf32> to vector<32x10xf32>
    %cst_193 = arith.constant dense<0.000000e+00> : vector<1x10xf32>
    %270 = tpu.matmul %267, %269, %cst_193 {dimension_numbers = #tpu.dot_dimension_numbers<[1], [0], [0], [1], [0, 0, 1, 1], [], []>} : vector<1x32xf32>, vector<32x10xf32>, vector<1x10xf32> -> vector<1x10xf32>
    %271 = arith.addf %266, %270 : vector<1x10xf32>
    %c1_194 = arith.constant 1 : index
    %c0_195 = arith.constant 0 : index
    %272 = vector.load %arg23[%c1_194, %c0_195] : memref<2x10xf32, #tpu.memory_space<vmem>>, vector<1x10xf32>
    tpu.vector_store %arg23[%c1_194, %c0_195], %271 {strides = array<i32>} : memref<2x10xf32, #tpu.memory_space<vmem>>, vector<1x10xf32>,
    return
  }
}

</mosaic_0001>

<bundles_post_ra>
// kernel: tile.13
= control target key start
LH: loop header
LB: loop body
LE: loop exit
PB: predicated region body
PF: predicated region fallthrough
CT: control target
= control target key end

     0   :  { %s34_s0 = inlined_call_operand.vmem [shape: f32[4], index: 0, kind: input, shape index: {}]   ;;  %s35_s1 = inlined_call_operand.vmem [shape: f32[24,4], index: 1, kind: output, shape index: {}]  }
   0x1   :  { %v4_v0 = vld [vmem:[%s34_s0] ss:$0 sm:$0xff] }
   0x2   :  { %5 = vst [vmem:[%s35_s1] sm:$0xff] %v4_v0  ;;  %10 = vst [vmem:[%s35_s1 + $0x8] sm:$0xff] %v4_v0 }
   0x3   :  { %11 = vst [vmem:[%s35_s1 + $0x10] sm:$0xff] %v4_v0 }

// kernel: tile.14
= control target key start
LH: loop header
LB: loop body
LE: loop exit
PB: predicated region body
PF: predicated region fallthrough
CT: control target
= control target key end

     0   :  { %s195_s10 = smov 92   ;;  %s196_s11 = smov 84   ;;  %vm3_vm0 = vcmask 31744   ;;  %vm9_vm1 = vcmask 786144   ;;  %vm15_vm2 = vcmask 753344   ;;  %vm21_vm3 = vcmask 720544   ;;  %s303_s0 = inlined_call_operand.vmem [shape: f32[24,4], index: 0, kind: input, shape index: {}]   ;;  %s304_s1 = inlined_call_operand.vmem [shape: f32[1,96], index: 1, kind: output, shape index: {}]  }
   0x1   :  { %v149_v0 = vld [vmem:[%s303_s0 + $0x17] sm:$0x1]   ;;  %v151_v1 = vld [vmem:[%s303_s0 + $0x15] sm:$0x1]   ;;  %v150_v2 = vld [vmem:[%s303_s0 + $0x16] sm:$0x1]  }
   0x2   :  { %7 = vrot.lane.b32.xlu0 %v149_v0, %s195_s10  ;;  %19 = vrot.lane.b32.xlu1 %v151_v1, %s196_s11  ;;  %v152_v3 = vld [vmem:[%s303_s0 + $0x14] sm:$0x1]   ;;  %s197_s16 = smov 88   ;;  %s198_s17 = smov 80   ;;  %v153_v4 = vld [vmem:[%s303_s0 + $0x13] sm:$0x1]  }
   0x3   :  { %v154_v5 = vld [vmem:[%s303_s0 + $0x12] sm:$0x1]   ;;  %s199_s22 = smov 76   ;;  %s200_s23 = smov 72   ;;  %v155_v6 = vld [vmem:[%s303_s0 + $0x11] sm:$0x1]  }
   0x4   :  { %v156_v7 = vld [vmem:[%s303_s0 + $0x10] sm:$0x1]   ;;  %v2_v8 = vld [vmem:[%s303_s0] sm:$0x1]   ;;  %s201_s30 = smov 68   ;;  %s202_s2 = smov 64  }
   0x5   :  { %4 = vst.msk [vmem:[#allocation0] sm:$0x1] %vm3_vm0, %v2_v8   ;;  %v157_v9 = vld [vmem:[%s303_s0 + $0xf] sm:$0x1]   ;;  %v158_v10 = vld [vmem:[%s303_s0 + $0xe] sm:$0x1]  }
   0x6   :  { %13 = vrot.lane.b32.xlu0 %v150_v2, %s197_s16  ;;  %25 = vrot.lane.b32.xlu1 %v152_v3, %s198_s17  ;;  %s203_s7 = smov 60   ;;  %s204_s8 = smov 56   ;;  %v159_v11 = vld [vmem:[%s303_s0 + $0xd] sm:$0x1]   ;;  %v160_v12 = vld [vmem:[%s303_s0 + $0xc] sm:$0x1]  }
   0x7   :  { %s205_s13 = smov 52   ;;  %s206_s14 = smov 48   ;;  %v161_v13 = vld [vmem:[%s303_s0 + $0xb] sm:$0x1]   ;;  %v162_v14 = vld [vmem:[%s303_s0 + $0xa] sm:$0x1]  }
   0x8   :  { %s207_s19 = smov 44   ;;  %s208_s20 = smov 40   ;;  %v163_v15 = vld [vmem:[%s303_s0 + $0x9] sm:$0x1]   ;;  %v164_v16 = vld [vmem:[%s303_s0 + $0x8] sm:$0x1]  }
   0x9   :  { %s209_s25 = smov 36   ;;  %s210_s26 = smov 32   ;;  %v165_v17 = vld [vmem:[%s303_s0 + $0x7] sm:$0x1]   ;;  %v166_v18 = vld [vmem:[%s303_s0 + $0x6] sm:$0x1]  }
   0xa   :  { %31 = vrot.lane.b32.xlu0 %v153_v4, %s199_s22  ;;  %37 = vrot.lane.b32.xlu1 %v154_v5, %s200_s23  ;;  %s212_s3 = smov 24   ;;  %v167_v19 = vld [vmem:[%s303_s0 + $0x5] sm:$0x1]   ;;  %v168_v20 = vld [vmem:[%s303_s0 + $0x4] sm:$0x1]   ;;  %s214_s9 = smov 16  }
   0xb   :  { %v169_v21 = vld [vmem:[%s303_s0 + $0x3] sm:$0x1]   ;;  %v170_v22 = vld [vmem:[%s303_s0 + $0x2] sm:$0x1]   ;;  %s216_s15 = smov 8   ;;  %vm27_vm4 = vcmask 687744  }
   0xc   :  { %v171_v23 = vld [vmem:[%s303_s0 + $0x1] sm:$0x1]   ;;  %s217_s0 = smov 4   ;;  %vm33_vm5 = vcmask 654944   ;;  %vm39_vm6 = vcmask 622144   ;;  %vm45_vm7 = vcmask 589344  }
   0xd   :  { %vm51_vm8 = vcmask 556544   ;;  %vm57_vm9 = vcmask 523744   ;;  %vm63_vm10 = vcmask 490944   ;;  %vm69_vm11 = vcmask 458144  }
   0xe   :  { %43 = vrot.lane.b32.xlu0 %v155_v6, %s201_s30  ;;  %49 = vrot.lane.b32.xlu1 %v156_v7, %s202_s2  ;;  %s211_s2 = smov 28   ;;  %vm75_vm12 = vcmask 425344   ;;  %vm81_vm13 = vcmask 392544   ;;  %vm87_vm14 = vcmask 359744   ;;  %vm93_vm15 = vcmask 326944  }
   0xf   :  { %vm99_vm0 = vcmask 294144  }
  0x12   :  { %55 = vrot.lane.b32.xlu0 %v157_v9, %s203_s7  ;;  %61 = vrot.lane.b32.xlu1 %v158_v10, %s204_s8  ;;  %s213_s8 = smov 20  }
  0x16   :  { %67 = vrot.lane.b32.xlu0 %v159_v11, %s205_s13  ;;  %73 = vrot.lane.b32.xlu1 %v160_v12, %s206_s14  ;;  %s215_s14 = smov 12  }
  0x1a   :  { %79 = vrot.lane.b32.xlu0 %v161_v13, %s207_s19  ;;  %85 = vrot.lane.b32.xlu1 %v162_v14, %s208_s20 }
  0x1e   :  { %91 = vrot.lane.b32.xlu0 %v163_v15, %s209_s25  ;;  %97 = vrot.lane.b32.xlu1 %v164_v16, %s210_s26 }
  0x22   :  { %103 = vrot.lane.b32.xlu0 %v165_v17, %s211_s2  ;;  %109 = vrot.lane.b32.xlu1 %v166_v18, %s212_s3 }
  0x26   :  { %115 = vrot.lane.b32.xlu0 %v167_v19, %s213_s8  ;;  %121 = vrot.lane.b32.xlu1 %v168_v20, %s214_s9 }
  0x2a   :  { %127 = vrot.lane.b32.xlu0 %v169_v21, %s215_s14  ;;  %133 = vrot.lane.b32.xlu1 %v170_v22, %s216_s15 }
  0x2e   :  { %139 = vrot.lane.b32.xlu0 %v171_v23, %s217_s0 }
  0x74   :  { %v8_v24 = vpop.permute.xlu0 %7   ;;  %v20_v25 = vpop.permute.xlu1 %19  }
  0x75   :  { %10 = vst.msk [vmem:[#allocation0] sm:$0x1] %vm9_vm1, %v8_v24   ;;  %vm105_vm1 = vcmask 261344  }
  0x78   :  { %v14_v26 = vpop.permute.xlu0 %13   ;;  %v26_v27 = vpop.permute.xlu1 %25  }
  0x79   :  { %16 = vst.msk [vmem:[#allocation0] sm:$0x1] %vm15_vm2, %v14_v26   ;;  %vm111_vm2 = vcmask 228544  }
  0x7a   :  { %22 = vst.msk [vmem:[#allocation0] sm:$0x1] %vm21_vm3, %v20_v25   ;;  %vm117_vm3 = vcmask 195744  }
  0x7b   :  { %28 = vst.msk [vmem:[#allocation0] sm:$0x1] %vm27_vm4, %v26_v27   ;;  %vm123_vm4 = vcmask 162944  }
  0x7c   :  { %v32_v28 = vpop.permute.xlu0 %31   ;;  %v38_v29 = vpop.permute.xlu1 %37  }
  0x7d   :  { %34 = vst.msk [vmem:[#allocation0] sm:$0x1] %vm33_vm5, %v32_v28   ;;  %vm129_vm5 = vcmask 130144  }
  0x7e   :  { %40 = vst.msk [vmem:[#allocation0] sm:$0x1] %vm39_vm6, %v38_v29   ;;  %vm135_vm6 = vcmask 97344  }
  0x80   :  { %v44_v30 = vpop.permute.xlu0 %43   ;;  %v50_v31 = vpop.permute.xlu1 %49  }
  0x81   :  { %46 = vst.msk [vmem:[#allocation0] sm:$0x1] %vm45_vm7, %v44_v30   ;;  %vm141_vm7 = vcmask 64544  }
  0x82   :  { %52 = vst.msk [vmem:[#allocation0] sm:$0x1] %vm51_vm8, %v50_v31  }
  0x84   :  { %v56_v32 = vpop.permute.xlu0 %55   ;;  %v62_v33 = vpop.permute.xlu1 %61  }
  0x85   :  { %58 = vst.msk [vmem:[#allocation0] sm:$0x1] %vm57_vm9, %v56_v32  }
  0x86   :  { %64 = vst.msk [vmem:[#allocation0] sm:$0x1] %vm63_vm10, %v62_v33  }
  0x88   :  { %v68_v34 = vpop.permute.xlu0 %67   ;;  %v74_v35 = vpop.permute.xlu1 %73  }
  0x89   :  { %70 = vst.msk [vmem:[#allocation0] sm:$0x1] %vm69_vm11, %v68_v34  }
  0x8a   :  { %76 = vst.msk [vmem:[#allocation0] sm:$0x1] %vm75_vm12, %v74_v35  }
  0x8c   :  { %v80_v36 = vpop.permute.xlu0 %79   ;;  %v86_v37 = vpop.permute.xlu1 %85  }
  0x8d   :  { %82 = vst.msk [vmem:[#allocation0] sm:$0x1] %vm81_vm13, %v80_v36  }
  0x8e   :  { %88 = vst.msk [vmem:[#allocation0] sm:$0x1] %vm87_vm14, %v86_v37  }
  0x90   :  { %v92_v38 = vpop.permute.xlu0 %91   ;;  %v98_v39 = vpop.permute.xlu1 %97  }
  0x91   :  { %94 = vst.msk [vmem:[#allocation0] sm:$0x1] %vm93_vm15, %v92_v38  }
  0x92   :  { %100 = vst.msk [vmem:[#allocation0] sm:$0x1] %vm99_vm0, %v98_v39  }
  0x94   :  { %v104_v40 = vpop.permute.xlu0 %103   ;;  %v110_v41 = vpop.permute.xlu1 %109  }
  0x95   :  { %106 = vst.msk [vmem:[#allocation0] sm:$0x1] %vm105_vm1, %v104_v40  }
  0x96   :  { %112 = vst.msk [vmem:[#allocation0] sm:$0x1] %vm111_vm2, %v110_v41  }
  0x98   :  { %v116_v42 = vpop.permute.xlu0 %115   ;;  %v122_v43 = vpop.permute.xlu1 %121  }
  0x99   :  { %118 = vst.msk [vmem:[#allocation0] sm:$0x1] %vm117_vm3, %v116_v42  }
  0x9a   :  { %124 = vst.msk [vmem:[#allocation0] sm:$0x1] %vm123_vm4, %v122_v43  }
  0x9c   :  { %v128_v44 = vpop.permute.xlu0 %127   ;;  %v134_v45 = vpop.permute.xlu1 %133  }
  0x9d   :  { %130 = vst.msk [vmem:[#allocation0] sm:$0x1] %vm129_vm5, %v128_v44  }
  0x9e   :  { %136 = vst.msk [vmem:[#allocation0] sm:$0x1] %vm135_vm6, %v134_v45  }
  0xa0   :  { %v140_v46 = vpop.permute.xlu0 %139  }
  0xa1   :  { %142 = vst.msk [vmem:[#allocation0] sm:$0x1] %vm141_vm7, %v140_v46  }
  0xa8   :  { %v146_v47 = vld [vmem:[#allocation0] sm:$0x1] }
  0xa9   :  { %148 = vst [vmem:[%s304_s1] sm:$0x1] %v146_v47 }

// kernel: tile.18
= control target key start
LH: loop header
LB: loop body
LE: loop exit
PB: predicated region body
PF: predicated region fallthrough
CT: control target
= control target key end

     0   :  { %s22_s0 = inlined_call_operand.vmem [shape: f32[8], index: 0, kind: input, shape index: {}]   ;;  %s23_s1 = inlined_call_operand.vmem [shape: f32[8,8], index: 1, kind: output, shape index: {}]  }
   0x1   :  { %v4_v0 = vld [vmem:[%s22_s0] ss:$0 sm:$0xff] }
   0x2   :  { %5 = vst [vmem:[%s23_s1] sm:$0xff] %v4_v0 }

// kernel: tile.19
= control target key start
LH: loop header
LB: loop body
LE: loop exit
PB: predicated region body
PF: predicated region fallthrough
CT: control target
= control target key end

     0   :  { %s67_s10 = smov 56   ;;  %s68_s11 = smov 40   ;;  %vm3_vm0 = vcmask 64512   ;;  %vm9_vm1 = vcmask 523712   ;;  %vm15_vm2 = vcmask 458112   ;;  %vm21_vm3 = vcmask 392512   ;;  %s111_s0 = inlined_call_operand.vmem [shape: f32[8,8], index: 0, kind: input, shape index: {}]   ;;  %s112_s1 = inlined_call_operand.vmem [shape: f32[1,64], index: 1, kind: output, shape index: {}]  }
   0x1   :  { %v53_v0 = vld [vmem:[%s111_s0 + $0x7] sm:$0x1]   ;;  %v55_v1 = vld [vmem:[%s111_s0 + $0x5] sm:$0x1]   ;;  %v54_v2 = vld [vmem:[%s111_s0 + $0x6] sm:$0x1]  }
   0x2   :  { %7 = vrot.lane.b32.xlu0 %v53_v0, %s67_s10  ;;  %19 = vrot.lane.b32.xlu1 %v55_v1, %s68_s11  ;;  %v56_v3 = vld [vmem:[%s111_s0 + $0x4] sm:$0x1]   ;;  %v2_v4 = vld [vmem:[%s111_s0] sm:$0x1]   ;;  %s69_s18 = smov 48   ;;  %s70_s19 = smov 32  }
   0x3   :  { %4 = vst.msk [vmem:[#allocation0] sm:$0x1] %vm3_vm0, %v2_v4   ;;  %v57_v5 = vld [vmem:[%s111_s0 + $0x3] sm:$0x1]   ;;  %v58_v6 = vld [vmem:[%s111_s0 + $0x2] sm:$0x1]  }
   0x4   :  { %s71_s24 = smov 24   ;;  %s72_s25 = smov 16   ;;  %v59_v7 = vld [vmem:[%s111_s0 + $0x1] sm:$0x1]   ;;  %vm27_vm4 = vcmask 326912   ;;  %vm33_vm5 = vcmask 261312  }
   0x5   :  { %s73_s0 = smov 8   ;;  %vm39_vm6 = vcmask 195712   ;;  %vm45_vm7 = vcmask 130112  }
   0x6   :  { %13 = vrot.lane.b32.xlu0 %v54_v2, %s69_s18  ;;  %25 = vrot.lane.b32.xlu1 %v56_v3, %s70_s19 }
   0xa   :  { %31 = vrot.lane.b32.xlu0 %v57_v5, %s71_s24  ;;  %37 = vrot.lane.b32.xlu1 %v58_v6, %s72_s25 }
   0xe   :  { %43 = vrot.lane.b32.xlu0 %v59_v7, %s73_s0 }
  0x74   :  { %v8_v8 = vpop.permute.xlu0 %7   ;;  %v20_v9 = vpop.permute.xlu1 %19  }
  0x75   :  { %10 = vst.msk [vmem:[#allocation0] sm:$0x1] %vm9_vm1, %v8_v8  }
  0x78   :  { %v14_v10 = vpop.permute.xlu0 %13   ;;  %v26_v11 = vpop.permute.xlu1 %25  }
  0x79   :  { %16 = vst.msk [vmem:[#allocation0] sm:$0x1] %vm15_vm2, %v14_v10  }
  0x7a   :  { %22 = vst.msk [vmem:[#allocation0] sm:$0x1] %vm21_vm3, %v20_v9  }
  0x7b   :  { %28 = vst.msk [vmem:[#allocation0] sm:$0x1] %vm27_vm4, %v26_v11  }
  0x7c   :  { %v32_v12 = vpop.permute.xlu0 %31   ;;  %v38_v13 = vpop.permute.xlu1 %37  }
  0x7d   :  { %34 = vst.msk [vmem:[#allocation0] sm:$0x1] %vm33_vm5, %v32_v12  }
  0x7e   :  { %40 = vst.msk [vmem:[#allocation0] sm:$0x1] %vm39_vm6, %v38_v13  }
  0x80   :  { %v44_v14 = vpop.permute.xlu0 %43  }
  0x81   :  { %46 = vst.msk [vmem:[#allocation0] sm:$0x1] %vm45_vm7, %v44_v14  }
  0x88   :  { %v50_v15 = vld [vmem:[#allocation0] sm:$0x1] }
  0x89   :  { %52 = vst [vmem:[%s112_s1] sm:$0x1] %v50_v15 }

// kernel: lenet_forward.1
= control target key start
LH: loop header
LB: loop body
LE: loop exit
PB: predicated region body
PF: predicated region fallthrough
CT: control target
= control target key end

     0   :  { %s7530_s0 = inlined_call_operand.vmem [shape: f32[2,28,28], index: 0, kind: input, shape index: {}]   ;;  %s7531_s1 = inlined_call_operand.vmem [shape: f32[5,28,96], index: 1, kind: input, shape index: {}]   ;;  %s7532_s2 = inlined_call_operand.vmem [shape: f32[1,96], index: 2, kind: input, shape index: {}]   ;;  %s7533_s3 = inlined_call_operand.vmem [shape: f32[96,48], index: 3, kind: input, shape index: {}]   ;;  %s7534_s4 = inlined_call_operand.vmem [shape: f32[96,48], index: 4, kind: input, shape index: {}]   ;;  %s7535_s5 = inlined_call_operand.vmem [shape: f32[12,24], index: 5, kind: input, shape index: {}]   ;;  %s7536_s6 = inlined_call_operand.vmem [shape: f32[12,24], index: 6, kind: input, shape index: {}]   ;;  %s7537_s7 = inlined_call_operand.vmem [shape: f32[48,4], index: 7, kind: input, shape index: {}]   ;;  %s7538_s8 = inlined_call_operand.vmem [shape: f32[4,48], index: 8, kind: input, shape index: {}]   ;;  %s7539_s9 = inlined_call_operand.vmem [shape: f32[1,4], index: 9, kind: input, shape index: {}]   ;;  %s7540_s10 = inlined_call_operand.vmem [shape: f32[1,4], index: 10, kind: input, shape index: {}]   ;;  %s7541_s11 = inlined_call_operand.vmem [shape: f32[5,48,64], index: 11, kind: input, shape index: {}]   ;;  %s7542_s12 = inlined_call_operand.vmem [shape: f32[1,64], index: 12, kind: input, shape index: {}]   ;;  %s7543_s13 = inlined_call_operand.vmem [shape: f32[64,32], index: 13, kind: input, shape index: {}]   ;;  %s7544_s14 = inlined_call_operand.vmem [shape: f32[64,32], index: 14, kind: input, shape index: {}]   ;;  %s7545_s15 = inlined_call_operand.vmem [shape: f32[4,8], index: 15, kind: input, shape index: {}]   ;;  %s7546_s16 = inlined_call_operand.vmem [shape: f32[4,8], index: 16, kind: input, shape index: {}]   ;;  %s7547_s17 = inlined_call_operand.vmem [shape: f32[32,8], index: 17, kind: input, shape index: {}]   ;;  %s7548_s18 = inlined_call_operand.vmem [shape: f32[8,32], index: 18, kind: input, shape index: {}]   ;;  %s7549_s19 = inlined_call_operand.vmem [shape: f32[1,8], index: 19, kind: input, shape index: {}]   ;;  %s7550_s20 = inlined_call_operand.vmem [shape: f32[1,8], index: 20, kind: input, shape index: {}]   ;;  %s7551_s21 = inlined_call_operand.vmem [shape: f32[4,32,10], index: 21, kind: input, shape index: {}]   ;;  %s7552_s22 = inlined_call_operand.vmem [shape: f32[1,10], index: 22, kind: input, shape index: {}]   ;;  %s7553_s23 = inlined_call_operand.hbm [shape: f32[2,10], index: 23, kind: output, shape index: {}]  }
   0x1   :  { %7561 = sst [smem:[#allocation5_spill]] %s7530_s0 }
   0x2   :  { %7562 = sst [smem:[#allocation6_spill]] %s7531_s1 }
   0x3   :  { %7563 = sst [smem:[#allocation7_spill]] %s7532_s2 }
   0x4   :  { %7564 = sst [smem:[#allocation8_spill]] %s7533_s3 }
   0x5   :  { %7565 = sst [smem:[#allocation9_spill]] %s7534_s4 }
   0x6   :  { %7566 = sst [smem:[#allocation10_spill]] %s7535_s5 }
   0x7   :  { %7567 = sst [smem:[#allocation11_spill]] %s7536_s6 }
   0x8   :  { %7568 = sst [smem:[#allocation12_spill]] %s7537_s7 }
   0x9   :  { %s7569_s24 = sld [smem:[#allocation6_spill]]  ;;  %vm136_vm0 = vcmask 1043456   ;;  %v6212_v3 = vmov 0.0|0.0   ;;  %vm6213_vm1 = vmmov 0   ;;  %v6214_v11 = vmov 0.0   ;;  %s7570_s1 = sld [smem:[#allocation5_spill]] }
   0xa   :  { %5791 = vmatprep.subr.bf16.mxu0 %v6212_v3  ;;  %5798 = vmatprep.subr.bf16.mxu1 %v6212_v3  ;;  %vm6215_vm2 = vmmov 1   ;;  %vm121_vm4 = vcmask 1046528   ;;  %vm129_vm5 = vcmask 228352  }
   0xb   :  { %5055 = vmatprep.mubr.msk.f32.mxu0 %vm6213_vm1, %v6214_v11  ;;  %5072 = vmatprep.mubr.msk.f32.mxu1 %vm6213_vm1, %v6214_v11  ;;  %vm6387_vm3 = vmpackc.low %vm136_vm0, %vm6215_vm2 }
   0xf   :  { %v4545_v0 = vld [vmem:[%s7569_s24 + $0x20] sm:$0xff]  ;;  %v4546_v1 = vld [vmem:[%s7569_s24 + $0x28] sm:$0xff]  ;;  %v4547_v6 = vld [vmem:[%s7569_s24 + $0x30] sm:$0xff] }
  0x10   :  { %v108_v2 = vld [vmem:[%s7569_s24] sm:$0xff]  ;;  %v6348_v4 = vpack.c.bf16 %v4546_v1, %v4545_v0  ;;  %v109_v5 = vld [vmem:[%s7569_s24 + $0x8] sm:$0xff]  ;;  %v4548_v7 = vld [vmem:[%s7569_s24 + $0x38] sm:$0xf] }
  0x11   :  { %v6359_v8 = vpack.c.bf16 %v109_v5, %v108_v2  ;;  %v110_v9 = vld [vmem:[%s7569_s24 + $0x10] sm:$0xff]  ;;  %v111_v10 = vld [vmem:[%s7569_s24 + $0x18] sm:$0xf]  ;;  %v6372_v12 = vpack.c.bf16 %v4548_v7, %v4547_v6  ;;  %v6377_v13 = vld [vmem:[%s7570_s1] sm:$0xff] }
  0x12   :  { %5793 = vmatpush3.bf16.msra.mxu0 %v6348_v4  ;;  %v6382_v14 = vld [vmem:[%s7570_s1 + $0x8] sm:$0xff]  ;;  %v6391_v16 = vpack.c.bf16 %v111_v10, %v110_v9  ;;  %v122_v17 = vrot.slane %v6377_v13, 1  ;;  %v6398_v19 = vld [vmem:[%s7570_s1 + $0x10] sm:$0xff]  ;;  %v4557_v20 = vld [vmem:[%s7569_s24 + $0x40] sm:$0xff] }
  0x13   :  { %5800 = vmatpush3.bf16.msra.mxu1 %v6359_v8  ;;  %5794 = vmatprep.subr.bf16.mxu0 %v6212_v3  ;;  %v123_v18 = vrot.slane %v6382_v14, 1  ;;  %v4558_v21 = vld [vmem:[%s7569_s24 + $0x48] sm:$0xff]  ;;  %v4565_v22 = vld [vmem:[%s7569_s24 + $0x60] sm:$0xff]  ;;  %v125_v25 = vrot.slane %v6398_v19, 1  ;;  %v6427_v27 = vld [vmem:[%s7570_s1 + $0x18] sm:$0xf] }
  0x14   :  { %5801 = vmatprep.subr.bf16.mxu1 %v6212_v3  ;;  %v4566_v23 = vld [vmem:[%s7569_s24 + $0x68] sm:$0xff]  ;;  %v6422_v26 = vpack.c.bf16 %v4558_v21, %v4557_v20 }
  0x15   :  { %v124_v24 = vsel %vm121_vm4, %v122_v17, %v123_v18 }
  0x16   :  { %5797 = vmatpush3.bf16.msk.msra.mxu0 %vm6387_vm3, %v6372_v12 }
  0x17   :  { %5804 = vmatpush3.bf16.msk.msra.mxu1 %vm6387_vm3, %v6391_v16  ;;  %5805 = vmatprep.subr.bf16.mxu0 %v6212_v3 }
  0x18   :  { %28 = vsyncpa [#allocation3], 0  ;;  %5812 = vmatprep.subr.bf16.mxu1 %v6212_v3  ;;  %v6430_v28 = vpack.c.bf16 %v4566_v23, %v4565_v22  ;;  %v4559_v29 = vld [vmem:[%s7569_s24 + $0x50] sm:$0xff]  ;;  %v4560_v30 = vld [vmem:[%s7569_s24 + $0x58] sm:$0xf]  ;;  %v126_v33 = vsel %vm121_vm4, %v123_v18, %v125_v25  ;;  %v127_v34 = vrot.slane %v6427_v27, 1 }
  0x19   :  { %5056 = vmatmul.mubr.msk.f32.vlgmr.msra.gmra.mrb[0].mxu0 %vm129_vm5, %v124_v24  ;;  %v4567_v31 = vld [vmem:[%s7569_s24 + $0x70] sm:$0xff]  ;;  %v4568_v32 = vld [vmem:[%s7569_s24 + $0x78] sm:$0xf]  ;;  %v6454_v35 = vpack.c.bf16 %v4560_v30, %v4559_v29  ;;  %v315_v38 = vrot.slane %v6377_v13, 2  ;;  %v316_v39 = vrot.slane %v6382_v14, 2  ;;  %vm314_vm6 = vcmask 1045504  }
  0x1a   :  { %5073 = vmatmul.mubr.msk.f32.vlgmr.msra.gmra.mrb[0].mxu1 %vm129_vm5, %v6377_v13  ;;  %5058 = vmatprep.mubr.msk.f32.mxu0 %vm6213_vm1, %v6214_v11  ;;  %v6458_v36 = vpack.c.bf16 %v4568_v32, %v4567_v31  ;;  %v128_v37 = vsel %vm121_vm4, %v125_v25, %v127_v34  ;;  %v420_v40 = vrot.slane %v6377_v13, 3  ;;  %v421_v41 = vrot.slane %v6382_v14, 3  ;;  %v4573_v42 = vld [vmem:[%s7569_s24 + $0x80] sm:$0xff]  ;;  %v4574_v43 = vld [vmem:[%s7569_s24 + $0x88] sm:$0xff]  ;;  %v4575_v49 = vld [vmem:[%s7569_s24 + $0x90] sm:$0xff]  ;;  %s7573_s28 = sld [smem:[#allocation8_spill]] }
  0x1b   :  { %5075 = vmatprep.mubr.msk.f32.mxu1 %vm6213_vm1, %v6214_v11  ;;  %5807 = vmatpush3.bf16.msra.mxu0 %v6422_v26  ;;  %vm419_vm7 = vcmask 1044480   ;;  %v317_v44 = vsel %vm314_vm6, %v315_v38, %v316_v39  ;;  %v318_v45 = vrot.slane %v6398_v19, 2  ;;  %v6497_v47 = vpack.c.bf16 %v4574_v43, %v4573_v42  ;;  %v4576_v50 = vld [vmem:[%s7569_s24 + $0x98] sm:$0xf]  ;;  %s7574_s30 = sld [smem:[#allocation9_spill]]  ;;  %s7575_s24 = sld [smem:[#allocation7_spill]] }
  0x1c   :  { %5814 = vmatpush3.bf16.msra.mxu1 %v6430_v28  ;;  %5808 = vmatprep.subr.bf16.mxu0 %v6212_v3  ;;  %v422_v46 = vsel %vm419_vm7, %v420_v40, %v421_v41  ;;  %v423_v48 = vrot.slane %v6398_v19, 3  ;;  %v320_v52 = vrot.slane %v6427_v27, 2  ;;  %v6516_v54 = vpack.c.bf16 %v4576_v50, %v4575_v49  ;;  %s7576_s3 = sld [smem:[#allocation10_spill]]  ;;  %s7577_s7 = sld [smem:[#allocation11_spill]] }
  0x1d   :  { %5059 = vmatmul.mubr.msk.f32.gmra.mrb[2].mxu0 %vm129_vm5, %v126_v33  ;;  %5815 = vmatprep.subr.bf16.mxu1 %v6212_v3  ;;  %v319_v51 = vsel %vm314_vm6, %v316_v39, %v318_v45  ;;  %v425_v55 = vrot.slane %v6427_v27, 3  ;;  %v524_v57 = vrot.slane %v6377_v13, 4  ;;  %v525_v58 = vrot.slane %v6382_v14, 4  ;;  %s7578_s25 = sld [smem:[#allocation12_spill]]  ;;  %s6216_s4 = smov [#allocation2]  }
  0x1e   :  { %5076 = vmatmul.mubr.msk.f32.gmra.mrb[2].mxu1 %vm129_vm5, %v6382_v14  ;;  %5061 = vmatprep.mubr.msk.f32.mxu0 %vm6213_vm1, %v6214_v11  ;;  %v424_v53 = vsel %vm419_vm7, %v421_v41, %v423_v48  ;;  %v321_v56 = vsel %vm314_vm6, %v318_v45, %v320_v52  ;;  %v527_v61 = vrot.slane %v6398_v19, 4  ;;  %v529_v63 = vrot.slane %v6427_v27, 4 }
  0x1f   :  { %5078 = vmatprep.mubr.msk.f32.mxu1 %vm6213_vm1, %v6214_v11  ;;  %5811 = vmatpush3.bf16.msk.msra.mxu0 %vm6387_vm3, %v6454_v35  ;;  %v426_v59 = vsel %vm419_vm7, %v423_v48, %v425_v55  ;;  %v526_v60 = vsel %vm136_vm0, %v524_v57, %v525_v58  ;;  %vm632_vm8 = vcmask 785408   ;;  %vm805_vm9 = vcmask 195584  }
  0x20   :  { %5818 = vmatpush3.bf16.msk.msra.mxu1 %vm6387_vm3, %v6458_v36  ;;  %5819 = vmatprep.subr.bf16.mxu0 %v6212_v3  ;;  %v528_v62 = vsel %vm136_vm0, %v525_v58, %v527_v61  ;;  %v530_v0 = vsel %vm136_vm0, %v527_v61, %v529_v63  ;;  %v76_v1 = vld [vmem:[%s7573_s28] sm:$0xff]  ;;  %v77_v2 = vld [vmem:[%s7573_s28 + $0x8] sm:$0xff]  ;;  %v78_v10 = vld [vmem:[%s7573_s28 + $0x10] sm:$0xff]  ;;  %vm1788_vm10 = vcmask 388096   ;;  %vm1786_vm11 = vcmask 392192  }
  0x21   :  { %5062 = vmatmul.mubr.msk.f32.gmra.mrb[4].mxu0 %vm129_vm5, %v128_v37  ;;  %5826 = vmatprep.subr.bf16.mxu1 %v6212_v3  ;;  %v88_v5 = vld [vmem:[%s7574_s30] sm:$0xff]  ;;  %v6563_v6 = vpack.c.bf16 %v77_v2, %v76_v1  ;;  %v89_v7 = vld [vmem:[%s7574_s30 + $0x8] sm:$0xff]  ;;  %v79_v13 = vld [vmem:[%s7573_s28 + $0x18] sm:$0xff]  ;;  %vm1985_vm12 = vcmask 31744   ;;  %vm2588_vm13 = vcmask 523264   ;;  %vm2733_vm14 = vcmask 64512  }
  0x22   :  { %5079 = vmatmul.mubr.msk.f32.gmra.mrb[4].mxu1 %vm129_vm5, %v6398_v19  ;;  %5089 = vmatprep.mubr.msk.f32.mxu0 %vm6213_vm1, %v6214_v11  ;;  %v6568_v9 = vpack.c.bf16 %v89_v7, %v88_v5  ;;  %v90_v14 = vld [vmem:[%s7574_s30 + $0x10] sm:$0xff]  ;;  %v6583_v17 = vpack.c.bf16 %v79_v13, %v78_v10  ;;  %v91_v18 = vld [vmem:[%s7574_s30 + $0x18] sm:$0xff]  ;;  %v80_v20 = vld [vmem:[%s7573_s28 + $0x20] sm:$0xff]  ;;  %vm3553_vm15 = vcmask 257024   ;;  %vm4216_vm2 = vcmask 73728  }
  0x23   :  { %5106 = vmatprep.mubr.msk.f32.mxu1 %vm6213_vm1, %v6214_v11  ;;  %v6588_v19 = vpack.c.bf16 %v91_v18, %v90_v14  ;;  %v81_v21 = vld [vmem:[%s7573_s28 + $0x28] sm:$0xff]  ;;  %v92_v22 = vld [vmem:[%s7574_s30 + $0x20] sm:$0xff]  ;;  %v82_v27 = vld [vmem:[%s7573_s28 + $0x30] sm:$0xff] }
  0x24   :  { %v6603_v23 = vpack.c.bf16 %v81_v21, %v80_v20  ;;  %v93_v24 = vld [vmem:[%s7574_s30 + $0x28] sm:$0xff]  ;;  %v83_v29 = vld [vmem:[%s7573_s28 + $0x38] sm:$0xff]  ;;  %v94_v30 = vld [vmem:[%s7574_s30 + $0x30] sm:$0xff] }
  0x25   :  { %5090 = vmatmul.mubr.msk.f32.vlgmr.msra.gmra.mrb[6].mxu0 %vm129_vm5, %v317_v44  ;;  %v6608_v25 = vpack.c.bf16 %v93_v24, %v92_v22  ;;  %v6623_v31 = vpack.c.bf16 %v83_v29, %v82_v27  ;;  %v95_v32 = vld [vmem:[%s7574_s30 + $0x38] sm:$0xff]  ;;  %v84_v34 = vld [vmem:[%s7573_s28 + $0x40] sm:$0xff]  ;;  %v85_v37 = vld [vmem:[%s7573_s28 + $0x48] sm:$0xff] }
  0x26   :  { %5107 = vmatmul.mubr.msk.f32.vlgmr.msra.gmra.mrb[6].mxu1 %vm129_vm5, %v422_v46  ;;  %5092 = vmatprep.mubr.msk.f32.mxu0 %vm6213_vm1, %v6214_v11  ;;  %v6628_v33 = vpack.c.bf16 %v95_v32, %v94_v30  ;;  %v96_v38 = vld [vmem:[%s7574_s30 + $0x40] sm:$0xff]  ;;  %v6643_v39 = vpack.c.bf16 %v85_v37, %v84_v34  ;;  %v97_v40 = vld [vmem:[%s7574_s30 + $0x48] sm:$0xff]  ;;  %v86_v42 = vld [vmem:[%s7573_s28 + $0x50] sm:$0xff] }
  0x27   :  { %5109 = vmatprep.mubr.msk.f32.mxu1 %vm6213_vm1, %v6214_v11  ;;  %5821 = vmatpush3.bf16.msra.mxu0 %v6497_v47  ;;  %v6648_v41 = vpack.c.bf16 %v97_v40, %v96_v38  ;;  %v87_v43 = vld [vmem:[%s7573_s28 + $0x58] sm:$0xff]  ;;  %v98_v44 = vld [vmem:[%s7574_s30 + $0x50] sm:$0xff]  ;;  %v6676_v38 = vld [vmem:[%s7575_s24] ss:$0 sm:$0xff] }
  0x28   :  { %5822 = vmatprep.subr.bf16.mxu0 %v6212_v3  ;;  %5828 = vmatpush3.bf16.msra.mxu1 %v6563_v6  ;;  %v6663_v45 = vpack.c.bf16 %v87_v43, %v86_v42  ;;  %v99_v46 = vld [vmem:[%s7574_s30 + $0x58] sm:$0xff] }
  0x29   :  { %5093 = vmatmul.mubr.msk.f32.gmra.mrb[8].mxu0 %vm129_vm5, %v319_v51  ;;  %5829 = vmatprep.subr.bf16.mxu1 %v6212_v3  ;;  %v6668_v48 = vpack.c.bf16 %v99_v46, %v98_v44 }
  0x2a   :  { %5110 = vmatmul.mubr.msk.f32.gmra.mrb[8].mxu1 %vm129_vm5, %v424_v53  ;;  %5095 = vmatprep.mubr.msk.f32.mxu0 %vm6213_vm1, %v6214_v11 }
  0x2b   :  { %5112 = vmatprep.mubr.msk.f32.mxu1 %vm6213_vm1, %v6214_v11  ;;  %5825 = vmatpush3.bf16.msk.msra.mxu0 %vm6387_vm3, %v6516_v54 }
  0x2c   :  { %5844 = vmatprep.subr.bf16.mxu0 %v6212_v3  ;;  %5831 = vmatpush3.bf16.msra.mxu1 %v6583_v17 }
  0x2d   :  { %5096 = vmatmul.mubr.msk.f32.gmra.mrb[10].mxu0 %vm129_vm5, %v321_v56  ;;  %5832 = vmatprep.subr.bf16.mxu1 %v6212_v3 }
  0x2e   :  { %5113 = vmatmul.mubr.msk.f32.gmra.mrb[10].mxu1 %vm129_vm5, %v426_v59  ;;  %5123 = vmatprep.mubr.msk.f32.mxu0 %vm6213_vm1, %v6214_v11 }
  0x2f   :  { %5156 = vmatprep.mubr.msk.f32.mxu1 %vm6213_vm1, %v6214_v11 }
  0x30   :  { %5834 = vmatpush3.bf16.msra.mxu1 %v6603_v23 }
  0x31   :  { %5124 = vmatmul.mubr.msk.f32.vlgmr.msra.gmra.mrb[12].mxu0 %vm129_vm5, %v526_v60  ;;  %5835 = vmatprep.subr.bf16.mxu1 %v6212_v3 }
  0x32   :  { %5126 = vmatprep.mubr.msk.f32.mxu0 %vm6213_vm1, %v6214_v11  ;;  %5846 = vmatpush3.bf16.msra.mxu0 %v6568_v9 }
  0x33   :  { %5847 = vmatprep.subr.bf16.mxu0 %v6212_v3 }
  0x34   :  { %5837 = vmatpush3.bf16.msra.mxu1 %v6623_v31 }
  0x35   :  { %5127 = vmatmul.mubr.msk.f32.gmra.mrb[14].mxu0 %vm129_vm5, %v528_v62  ;;  %5838 = vmatprep.subr.bf16.mxu1 %v6212_v3 }
  0x36   :  { %5129 = vmatprep.mubr.msk.f32.mxu0 %vm6213_vm1, %v6214_v11  ;;  %5849 = vmatpush3.bf16.msra.mxu0 %v6588_v19 }
  0x37   :  { %5850 = vmatprep.subr.bf16.mxu0 %v6212_v3 }
  0x38   :  { %5840 = vmatpush3.bf16.msra.mxu1 %v6643_v39 }
  0x39   :  { %5130 = vmatmul.mubr.msk.f32.gmra.mrb[16].mxu0 %vm129_vm5, %v530_v0  ;;  %5841 = vmatprep.subr.bf16.mxu1 %v6212_v3 }
  0x3a   :  { %5189 = vmatprep.mubr.msk.f32.mxu0 %vm6213_vm1, %v6214_v11  ;;  %5852 = vmatpush3.bf16.msra.mxu0 %v6608_v25 }
  0x3b   :  { %5853 = vmatprep.subr.bf16.mxu0 %v6212_v3 }
  0x3c   :  { %5843 = vmatpush3.bf16.msra.mxu1 %v6663_v45 }
  0x3e   :  { %5855 = vmatpush3.bf16.msra.mxu0 %v6628_v33 }
  0x3f   :  { %5856 = vmatprep.subr.bf16.mxu0 %v6212_v3 }
  0x42   :  { %5858 = vmatpush3.bf16.msra.mxu0 %v6648_v41 }
  0x43   :  { %5859 = vmatprep.subr.bf16.mxu0 %v6212_v3 }
  0x46   :  { %5861 = vmatpush3.bf16.msra.mxu0 %v6668_v48 }
  0x47   :  { %5870 = vmatprep.subr.bf16.mxu0 %v6212_v3 }
  0xec   :  { %v206_v49 = vpop.f32.mrb[0].mxu0 }
  0xed   :  { %v295_v50 = vpop.f32.mrb[0].mxu1  ;;  %v5057_v51 = vpop.f32.mrb[1].mxu0 }
  0xee   :  { %v296_v52 = vadd.f32 %v295_v50, %v206_v49  ;;  %v5074_v53 = vpop.f32.mrb[1].mxu1 }
  0xf0   :  { %v211_v55 = vpop.f32.mrb[2].mxu0 }
  0xf1   :  { %v300_v56 = vpop.f32.mrb[2].mxu1  ;;  %v5060_v57 = vpop.f32.mrb[3].mxu0 }
  0xf2   :  { %v301_v58 = vadd.f32 %v300_v56, %v211_v55  ;;  %v5077_v59 = vpop.f32.mrb[3].mxu1  ;;  %v6718_v57 = vld [vmem:[%s7570_s1 + $0x28] sm:$0xff] }
  0xf3   :  { %v982_v59 = vrot.slane %v6718_v57, 1 }
  0xf4   :  { %v216_v60 = vpop.f32.mrb[4].mxu0 }
  0xf5   :  { %v305_v61 = vpop.f32.mrb[4].mxu1  ;;  %v5063_v62 = vpop.f32.mrb[5].mxu0 }
  0xf6   :  { %v306_v63 = vadd.f32 %v305_v61, %v216_v60  ;;  %v5080_v0 = vpop.f32.mrb[5].mxu1  ;;  %v6727_v61 = vld [vmem:[%s7570_s1 + $0x30] sm:$0xff] }
  0xf7   :  { %v984_v62 = vrot.slane %v6727_v61, 1  ;;  %v6739_v0 = vld [vmem:[%s7570_s1 + $0x38] sm:$0xf] }
  0xf8   :  { %v397_v1 = vpop.f32.mrb[6].mxu0 }
  0xf9   :  { %v411_v2 = vadd.f32 %v397_v1, %v296_v52  ;;  %v5091_v5 = vpop.f32.mrb[7].mxu0  ;;  %v502_v7 = vpop.f32.mrb[6].mxu1  ;;  %v986_v1 = vrot.slane %v6739_v0, 1 }
  0xfa   :  { %v5108_v10 = vpop.f32.mrb[7].mxu1  ;;  %v1161_v5 = vrot.slane %v6718_v57, 2 }
  0xfb   :  { %v516_v13 = vadd.f32 %v502_v7, %v411_v2 }
  0xfc   :  { %v402_v14 = vpop.f32.mrb[8].mxu0 }
  0xfd   :  { %v412_v18 = vadd.f32 %v402_v14, %v301_v58  ;;  %v5094_v20 = vpop.f32.mrb[9].mxu0  ;;  %v507_v21 = vpop.f32.mrb[8].mxu1 }
  0xfe   :  { %v5111_v22 = vpop.f32.mrb[9].mxu1 }
  0xff   :  { %v517_v24 = vadd.f32 %v507_v21, %v412_v18  ;;  %v1353_v18 = vrot.slane %v6718_v57, 4  ;;  %v1357_v22 = vrot.slane %v6739_v0, 4 }
 0x100   :  { %v407_v27 = vpop.f32.mrb[10].mxu0 }
 0x101   :  { %v413_v29 = vadd.f32 %v407_v27, %v306_v63  ;;  %v5097_v30 = vpop.f32.mrb[11].mxu0  ;;  %v512_v32 = vpop.f32.mrb[10].mxu1  ;;  %v985_v63 = vsel %vm121_vm4, %v982_v59, %v984_v62 }
 0x102   :  { %v5114_v34 = vpop.f32.mrb[11].mxu1 }
 0x103   :  { %v518_v37 = vadd.f32 %v512_v32, %v413_v29 }
 0x104   :  { %v606_v40 = vpop.f32.mrb[12].mxu0 }
 0x105   :  { %v620_v42 = vadd.f32 %v606_v40, %v516_v13  ;;  %v5125_v43 = vpop.f32.mrb[13].mxu0  ;;  %v1165_v13 = vrot.slane %v6739_v0, 2 }
 0x107   :  { %v629_v44 = vadd.f32 %v6676_v38, %v620_v42 }
 0x108   :  { %v611_v46 = vpop.f32.mrb[14].mxu0 }
 0x109   :  { %v621_v49 = vadd.f32 %v611_v46, %v517_v24  ;;  %v5128_v50 = vpop.f32.mrb[15].mxu0  ;;  %5157 = vmatmul.mubr.msk.f32.vlgmr.msra.gmra.mrb[12].mxu1 %vm632_vm8, %v629_v44  ;;  %5190 = vmatmul.mubr.msk.f32.vlgmr.msra.gmra.mrb[18].mxu0 %vm632_vm8, %v629_v44 }
 0x10a   :  { %5159 = vmatprep.mubr.msk.f32.mxu1 %vm6213_vm1, %v6214_v11  ;;  %5192 = vmatprep.mubr.msk.f32.mxu0 %vm6213_vm1, %v6214_v11  ;;  %v6819_v50 = vld [vmem:[%s7577_s7 + $0x8] sm:$0xf] }
 0x10b   :  { %v630_v51 = vadd.f32 %v6676_v38, %v621_v49  ;;  %5872 = vmatpush3.bf16.msra.mxu0 %v6348_v4  ;;  %v6706_v4 = vld [vmem:[%s7576_s3] sm:$0xff] }
 0x10c   :  { %v616_v52 = vpop.f32.mrb[16].mxu0  ;;  %5873 = vmatprep.subr.bf16.mxu0 %v6212_v3  ;;  %v6810_v49 = vld [vmem:[%s7577_s7] sm:$0xff] }
 0x10d   :  { %v622_v53 = vadd.f32 %v616_v52, %v518_v37  ;;  %5160 = vmatmul.mubr.msk.f32.gmra.mrb[14].mxu1 %vm632_vm8, %v630_v51  ;;  %5193 = vmatmul.mubr.msk.f32.gmra.mrb[20].mxu0 %vm632_vm8, %v630_v51  ;;  %v5131_v55 = vpop.f32.mrb[17].mxu0  ;;  %v1259_v51 = vrot.slane %v6727_v61, 3 }
 0x10e   :  { %5162 = vmatprep.mubr.msk.f32.mxu1 %vm6213_vm1, %v6214_v11  ;;  %5195 = vmatprep.mubr.msk.f32.mxu0 %vm6213_vm1, %v6214_v11 }
 0x10f   :  { %v631_v56 = vadd.f32 %v6676_v38, %v622_v53  ;;  %5876 = vmatpush3.bf16.msk.msra.mxu0 %vm6387_vm3, %v6372_v12  ;;  %v6713_v12 = vld [vmem:[%s7570_s1 + $0x20] sm:$0xff] }
 0x110   :  { %5884 = vmatprep.subr.bf16.mxu0 %v6212_v3  ;;  %v981_v58 = vrot.slane %v6713_v12, 1  ;;  %v1160_v2 = vrot.slane %v6713_v12, 2 }
 0x111   :  { %5163 = vmatmul.mubr.msk.f32.gmra.mrb[16].mxu1 %vm632_vm8, %v631_v56  ;;  %5196 = vmatmul.mubr.msk.f32.gmra.mrb[22].mxu0 %vm632_vm8, %v631_v56 }
 0x112   :  { %5224 = vmatprep.mubr.msk.f32.mxu0 %vm6213_vm1, %v6214_v11  ;;  %5204 = vmatprep.mubr.msk.f32.mxu1 %vm805_vm9, %v6706_v4  ;;  %v983_v60 = vsel %vm121_vm4, %v981_v58, %v982_v59  ;;  %v1162_v7 = vsel %vm314_vm6, %v1160_v2, %v1161_v5 }
 0x115   :  { %5225 = vmatmul.mubr.msk.f32.vlgmr.msra.gmra.mrb[24].mxu0 %vm129_vm5, %v983_v60 }
 0x116   :  { %5227 = vmatprep.mubr.msk.f32.mxu0 %vm6213_vm1, %v6214_v11  ;;  %5886 = vmatpush3.bf16.msra.mxu0 %v6422_v26  ;;  %v987_v26 = vsel %vm121_vm4, %v984_v62, %v986_v1 }
 0x117   :  { %5887 = vmatprep.subr.bf16.mxu0 %v6212_v3 }
 0x119   :  { %5228 = vmatmul.mubr.msk.f32.gmra.mrb[26].mxu0 %vm129_vm5, %v985_v63 }
 0x11a   :  { %5230 = vmatprep.mubr.msk.f32.mxu0 %vm6213_vm1, %v6214_v11  ;;  %5890 = vmatpush3.bf16.msk.msra.mxu0 %vm6387_vm3, %v6454_v35  ;;  %v1163_v35 = vrot.slane %v6727_v61, 2 }
 0x11b   :  { %5898 = vmatprep.subr.bf16.mxu0 %v6212_v3 }
 0x11c   :  { %v1164_v10 = vsel %vm314_vm6, %v1161_v5, %v1163_v35  ;;  %v1166_v14 = vsel %vm314_vm6, %v1163_v35, %v1165_v13 }
 0x11d   :  { %5231 = vmatmul.mubr.msk.f32.gmra.mrb[28].mxu0 %vm129_vm5, %v987_v26 }
 0x11e   :  { %5258 = vmatprep.mubr.msk.f32.mxu0 %vm6213_vm1, %v6214_v11 }
 0x121   :  { %5259 = vmatmul.mubr.msk.f32.vlgmr.msra.gmra.mrb[30].mxu0 %vm129_vm5, %v1162_v7 }
 0x122   :  { %5261 = vmatprep.mubr.msk.f32.mxu0 %vm6213_vm1, %v6214_v11  ;;  %5900 = vmatpush3.bf16.msra.mxu0 %v6497_v47  ;;  %v1352_v47 = vrot.slane %v6713_v12, 4 }
 0x123   :  { %5901 = vmatprep.subr.bf16.mxu0 %v6212_v3 }
 0x124   :  { %v1354_v20 = vsel %vm136_vm0, %v1352_v47, %v1353_v18 }
 0x125   :  { %5262 = vmatmul.mubr.msk.f32.gmra.mrb[32].mxu0 %vm129_vm5, %v1164_v10 }
 0x126   :  { %5264 = vmatprep.mubr.msk.f32.mxu0 %vm6213_vm1, %v6214_v11  ;;  %5904 = vmatpush3.bf16.msk.msra.mxu0 %vm6387_vm3, %v6516_v54  ;;  %v1355_v54 = vrot.slane %v6727_v61, 4 }
 0x127   :  { %5923 = vmatprep.subr.bf16.mxu0 %v6212_v3 }
 0x128   :  { %v1356_v21 = vsel %vm136_vm0, %v1353_v18, %v1355_v54  ;;  %v1358_v24 = vsel %vm136_vm0, %v1355_v54, %v1357_v22 }
 0x129   :  { %5265 = vmatmul.mubr.msk.f32.gmra.mrb[34].mxu0 %vm129_vm5, %v1166_v14 }
 0x12a   :  { %5292 = vmatprep.mubr.msk.f32.mxu0 %vm6213_vm1, %v6214_v11 }
 0x12d   :  { %5293 = vmatmul.mubr.msk.f32.vlgmr.msra.gmra.mrb[36].mxu0 %vm129_vm5, %v1354_v20 }
 0x12e   :  { %5295 = vmatprep.mubr.msk.f32.mxu0 %vm6213_vm1, %v6214_v11  ;;  %5925 = vmatpush3.bf16.msra.mxu0 %v6568_v9 }
 0x12f   :  { %5926 = vmatprep.subr.bf16.mxu0 %v6212_v3 }
 0x131   :  { %5296 = vmatmul.mubr.msk.f32.gmra.mrb[38].mxu0 %vm129_vm5, %v1356_v21 }
 0x132   :  { %5298 = vmatprep.mubr.msk.f32.mxu0 %vm6213_vm1, %v6214_v11  ;;  %5928 = vmatpush3.bf16.msra.mxu0 %v6588_v19 }
 0x133   :  { %5929 = vmatprep.subr.bf16.mxu0 %v6212_v3 }
 0x135   :  { %5299 = vmatmul.mubr.msk.f32.gmra.mrb[40].mxu0 %vm129_vm5, %v1358_v24 }
 0x136   :  { %5931 = vmatpush3.bf16.msra.mxu0 %v6608_v25  ;;  %5358 = vmatprep.mubr.msk.f32.mxu0 %vm6213_vm1, %v6214_v11 }
 0x137   :  { %5932 = vmatprep.subr.bf16.mxu0 %v6212_v3 }
 0x13a   :  { %5934 = vmatpush3.bf16.msra.mxu0 %v6628_v33 }
 0x13b   :  { %5935 = vmatprep.subr.bf16.mxu0 %v6212_v3 }
 0x13e   :  { %5937 = vmatpush3.bf16.msra.mxu0 %v6648_v41 }
 0x13f   :  { %5938 = vmatprep.subr.bf16.mxu0 %v6212_v3 }
 0x142   :  { %5940 = vmatpush3.bf16.msra.mxu0 %v6668_v48  ;;  %v6805_v48 = vld [vmem:[%s7576_s3 + $0x8] sm:$0xf] }
 0x143   :  { %5949 = vmatprep.subr.bf16.mxu0 %v6212_v3 }
 0x1dc   :  { %v708_v9 = vpop.f32.mrb[12].mxu1  ;;  %v788_v19 = vpop.f32.mrb[18].mxu0 }
 0x1dd   :  { %v802_v25 = vmax.f32 %v708_v9, %v788_v19  ;;  %v5158_v27 = vpop.f32.mrb[13].mxu1  ;;  %v5191_v29 = vpop.f32.mrb[19].mxu0 }
 0x1e0   :  { %v713_v30 = vpop.f32.mrb[14].mxu1  ;;  %v793_v32 = vpop.f32.mrb[20].mxu0 }
 0x1e1   :  { %v803_v34 = vmax.f32 %v713_v30, %v793_v32  ;;  %v5161_v37 = vpop.f32.mrb[15].mxu1  ;;  %v5194_v33 = vpop.f32.mrb[21].mxu0 }
 0x1e3   :  { %v5862_v40 = vpack.c.bf16 %v803_v34, %v802_v25 }
 0x1e4   :  { %v718_v42 = vpop.f32.mrb[16].mxu1  ;;  %v798_v43 = vpop.f32.mrb[22].mxu0 }
 0x1e5   :  { %v804_v41 = vmax.f32 %v718_v42, %v798_v43  ;;  %v5164_v44 = vpop.f32.mrb[17].mxu1  ;;  %v5197_v46 = vpop.f32.mrb[23].mxu0  ;;  %5863 = vmatprep.subr.bf16.mxu1 %v5862_v40 }
 0x1e6   :  { %5865 = vmatpush3.bf16.msra.mxu1 %v5862_v40 }
 0x1e7   :  { %5202 = vmatprep.subr.mxu1 %v804_v41 }
 0x1ea   :  { %5203 = vmatpush3.msra.mxu1 %v804_v41 }
 0x1eb   :  { %5205 = vmatmul.mubr.msk.f32.vlgmr.msra.gmra.mrb[18].mxu1 %vm805_vm9, %v6805_v48  ;;  %5867 = vmatprep.subr.bf16.mxu1 %v5862_v40 }
 0x1ec   :  { %5869 = vmatpush3.bf16.msra.mxu1 %v5862_v40  ;;  %5213 = vmatprep.mubr.msk.f32.mxu1 %vm805_vm9, %v6810_v49 }
 0x1ed   :  { %5211 = vmatprep.subr.mxu1 %v804_v41 }
 0x1f0   :  { %5212 = vmatpush3.msra.mxu1 %v804_v41 }
 0x1f1   :  { %5214 = vmatmul.mubr.msk.f32.vlgmr.msra.gmra.mrb[20].mxu1 %vm805_vm9, %v6819_v50  ;;  %5877 = vmatprep.subr.bf16.mxu1 %v6212_v3 }
 0x1f2   :  { %5879 = vmatpush3.bf16.msra.mxu1 %v6359_v8  ;;  %5241 = vmatprep.mubr.msk.f32.mxu1 %vm6213_vm1, %v6214_v11  ;;  %v1256_v8 = vrot.slane %v6713_v12, 3 }
 0x1f3   :  { %5880 = vmatprep.subr.bf16.mxu1 %v6212_v3 }
 0x1f6   :  { %5883 = vmatpush3.bf16.msk.msra.mxu1 %vm6387_vm3, %v6391_v16  ;;  %v1257_v16 = vrot.slane %v6718_v57, 3 }
 0x1f7   :  { %5891 = vmatprep.subr.bf16.mxu1 %v6212_v3 }
 0x1f8   :  { %v1260_v15 = vsel %vm419_vm7, %v1257_v16, %v1259_v51 }
 0x1f9   :  { %5242 = vmatmul.mubr.msk.f32.vlgmr.msra.gmra.mrb[22].mxu1 %vm129_vm5, %v6713_v12 }
 0x1fa   :  { %5244 = vmatprep.mubr.msk.f32.mxu1 %vm6213_vm1, %v6214_v11  ;;  %5893 = vmatpush3.bf16.msra.mxu1 %v6430_v28  ;;  %v1258_v28 = vsel %vm419_vm7, %v1256_v8, %v1257_v16 }
 0x1fb   :  { %5894 = vmatprep.subr.bf16.mxu1 %v6212_v3 }
 0x1fd   :  { %5245 = vmatmul.mubr.msk.f32.gmra.mrb[24].mxu1 %vm129_vm5, %v6718_v57 }
 0x1fe   :  { %5247 = vmatprep.mubr.msk.f32.mxu1 %vm6213_vm1, %v6214_v11  ;;  %5897 = vmatpush3.bf16.msk.msra.mxu1 %vm6387_vm3, %v6458_v36  ;;  %v1261_v36 = vrot.slane %v6739_v0, 3 }
 0x1ff   :  { %5905 = vmatprep.subr.bf16.mxu1 %v6212_v3 }
 0x200   :  { %v1262_v52 = vsel %vm419_vm7, %v1259_v51, %v1261_v36 }
 0x201   :  { %5248 = vmatmul.mubr.msk.f32.gmra.mrb[26].mxu1 %vm129_vm5, %v6727_v61 }
 0x202   :  { %5275 = vmatprep.mubr.msk.f32.mxu1 %vm6213_vm1, %v6214_v11 }
 0x205   :  { %5276 = vmatmul.mubr.msk.f32.vlgmr.msra.gmra.mrb[28].mxu1 %vm129_vm5, %v1258_v28 }
 0x206   :  { %5278 = vmatprep.mubr.msk.f32.mxu1 %vm6213_vm1, %v6214_v11  ;;  %5907 = vmatpush3.bf16.msra.mxu1 %v6563_v6  ;;  %v1060_v6 = vpop.f32.mrb[24].mxu0 }
 0x207   :  { %5908 = vmatprep.subr.bf16.mxu1 %v6212_v3 }
 0x209   :  { %5279 = vmatmul.mubr.msk.f32.gmra.mrb[30].mxu1 %vm129_vm5, %v1260_v15 }
 0x20a   :  { %5281 = vmatprep.mubr.msk.f32.mxu1 %vm6213_vm1, %v6214_v11  ;;  %5910 = vmatpush3.bf16.msra.mxu1 %v6583_v17  ;;  %v5226_v17 = vpop.f32.mrb[25].mxu0 }
 0x20b   :  { %5911 = vmatprep.subr.bf16.mxu1 %v6212_v3  ;;  %v1065_v53 = vpop.f32.mrb[26].mxu0 }
 0x20c   :  { %v5229_v55 = vpop.f32.mrb[27].mxu0 }
 0x20d   :  { %5282 = vmatmul.mubr.msk.f32.gmra.mrb[32].mxu1 %vm129_vm5, %v1262_v52 }
 0x20e   :  { %5913 = vmatpush3.bf16.msra.mxu1 %v6603_v23  ;;  %5325 = vmatprep.mubr.msk.f32.mxu1 %vm6213_vm1, %v6214_v11  ;;  %v1070_v23 = vpop.f32.mrb[28].mxu0 }
 0x20f   :  { %5914 = vmatprep.subr.bf16.mxu1 %v6212_v3  ;;  %v5232_v56 = vpop.f32.mrb[29].mxu0 }
 0x210   :  { %v1239_v12 = vpop.f32.mrb[30].mxu0 }
 0x211   :  { %v5260_v57 = vpop.f32.mrb[31].mxu0 }
 0x212   :  { %5916 = vmatpush3.bf16.msra.mxu1 %v6623_v31  ;;  %v1244_v58 = vpop.f32.mrb[32].mxu0 }
 0x213   :  { %5917 = vmatprep.subr.bf16.mxu1 %v6212_v3  ;;  %v5263_v59 = vpop.f32.mrb[33].mxu0 }
 0x214   :  { %v1249_v60 = vpop.f32.mrb[34].mxu0 }
 0x215   :  { %v5266_v31 = vpop.f32.mrb[35].mxu0 }
 0x216   :  { %5919 = vmatpush3.bf16.msra.mxu1 %v6643_v39  ;;  %v1431_v61 = vpop.f32.mrb[36].mxu0  ;;  %v1781_v31 = vld [vmem:[%s7578_s25 + $0x20] sm:$0xff] }
 0x217   :  { %5920 = vmatprep.subr.bf16.mxu1 %v6212_v3  ;;  %v5294_v62 = vpop.f32.mrb[37].mxu0 }
 0x218   :  { %v1436_v63 = vpop.f32.mrb[38].mxu0 }
 0x219   :  { %v5297_v39 = vpop.f32.mrb[39].mxu0 }
 0x21a   :  { %5922 = vmatpush3.bf16.msra.mxu1 %v6663_v45  ;;  %v1441_v0 = vpop.f32.mrb[40].mxu0 }
 0x21b   :  { %v5300_v1 = vpop.f32.mrb[41].mxu0 }
 0x2be   :  { %v6877_v26 = vpop.f32.mrb[18].mxu1 }
 0x2bf   :  { %v6879_v45 = vpop.f32.mrb[19].mxu1 }
 0x2c4   :  { %v6881_v2 = vpop.f32.mrb[20].mxu1 }
 0x2c5   :  { %v969_v5 = vmax.f32 %v6877_v26, %v6881_v2  ;;  %v6885_v7 = vpop.f32.mrb[21].mxu1 }
 0x2c6   :  { %v968_v35 = vmax.f32 %v6879_v45, %v6885_v7 }
 0x2c8   :  { %v6951_v39 = vmax.f32 %v968_v35, 0.0 }
 0x2ca   :  { %v1797_v1 = vmul.f32 %v6951_v39, %v6951_v39  ;;  %v1787_v26 = vsel %vm1786_vm11, %v6951_v39, 0.0 }
 0x2cc   :  { %v1146_v10 = vpop.f32.mrb[22].mxu1  ;;  %v1799_v45 = vsel %vm1786_vm11, %v1797_v1, 0.0 }
 0x2cd   :  { %v1147_v13 = vadd.f32 %v1146_v10, %v1060_v6  ;;  %v5243_v14 = vpop.f32.mrb[23].mxu1 }
 0x2cf   :  { %v1253_v47 = vadd.f32 %v1239_v12, %v1147_v13 }
 0x2d0   :  { %v1151_v18 = vpop.f32.mrb[24].mxu1 }
 0x2d1   :  { %v1152_v20 = vadd.f32 %v1151_v18, %v1065_v53  ;;  %v5246_v54 = vpop.f32.mrb[25].mxu1 }
 0x2d3   :  { %v1254_v21 = vadd.f32 %v1244_v58, %v1152_v20 }
 0x2d4   :  { %v1156_v22 = vpop.f32.mrb[26].mxu1 }
 0x2d5   :  { %v1157_v24 = vadd.f32 %v1156_v22, %v1070_v23  ;;  %v5249_v9 = vpop.f32.mrb[27].mxu1 }
 0x2d7   :  { %v1255_v19 = vadd.f32 %v1249_v60, %v1157_v24 }
 0x2d8   :  { %v1335_v25 = vpop.f32.mrb[28].mxu1 }
 0x2d9   :  { %v1349_v27 = vadd.f32 %v1335_v25, %v1253_v47  ;;  %v5277_v29 = vpop.f32.mrb[29].mxu1 }
 0x2db   :  { %v1445_v30 = vadd.f32 %v1431_v61, %v1349_v27  ;;  %v1782_v61 = vld [vmem:[%s7578_s25 + $0x28] sm:$0xff] }
 0x2dc   :  { %v1340_v32 = vpop.f32.mrb[30].mxu1  ;;  %v5956_v62 = vpack.c.bf16 %v1782_v61, %v1781_v31 }
 0x2dd   :  { %v1448_v34 = vadd.f32 %v6676_v38, %v1445_v30  ;;  %v1350_v37 = vadd.f32 %v1340_v32, %v1254_v21  ;;  %v5280_v33 = vpop.f32.mrb[31].mxu1 }
 0x2df   :  { %v1446_v40 = vadd.f32 %v1436_v63, %v1350_v37  ;;  %5326 = vmatmul.mubr.msk.f32.vlgmr.msra.gmra.mrb[34].mxu1 %vm632_vm8, %v1448_v34  ;;  %5359 = vmatmul.mubr.msk.f32.vlgmr.msra.gmra.mrb[42].mxu0 %vm632_vm8, %v1448_v34  ;;  %v6946_v63 = vmax.f32 %v969_v5, 0.0 }
 0x2e0   :  { %v1345_v42 = vpop.f32.mrb[32].mxu1  ;;  %5328 = vmatprep.mubr.msk.f32.mxu1 %vm6213_vm1, %v6214_v11  ;;  %5361 = vmatprep.mubr.msk.f32.mxu0 %vm6213_vm1, %v6214_v11 }
 0x2e1   :  { %v1449_v43 = vadd.f32 %v6676_v38, %v1446_v40  ;;  %v1351_v41 = vadd.f32 %v1345_v42, %v1255_v19  ;;  %v5283_v44 = vpop.f32.mrb[33].mxu1  ;;  %v1789_v10 = vsel %vm1788_vm10, %v6946_v63, 0.0 }
 0x2e2   :  { %v1790_v7 = vadd.f32 %v1789_v10, %v1787_v26  ;;  %v1784_v26 = vld [vmem:[%s7539_s9] sm:$0x1] }
 0x2e3   :  { %v1447_v46 = vadd.f32 %v1441_v0, %v1351_v41  ;;  %5329 = vmatmul.mubr.msk.f32.gmra.mrb[36].mxu1 %vm632_vm8, %v1449_v43  ;;  %5362 = vmatmul.mubr.msk.f32.gmra.mrb[44].mxu0 %vm632_vm8, %v1449_v43  ;;  %v1798_v0 = vmul.f32 %v6946_v63, %v6946_v63 }
 0x2e4   :  { %5331 = vmatprep.mubr.msk.f32.mxu1 %vm6213_vm1, %v6214_v11  ;;  %5364 = vmatprep.mubr.msk.f32.mxu0 %vm6213_vm1, %v6214_v11  ;;  %v1791_v14 = vrot.slane %v1790_v7, 4 }
 0x2e5   :  { %v1450_v8 = vadd.f32 %v6676_v38, %v1447_v46  ;;  %v1800_v2 = vsel %vm1788_vm10, %v1798_v0, 0.0 }
 0x2e6   :  { %v1801_v13 = vadd.f32 %v1800_v2, %v1799_v45  ;;  %v1792_v22 = vadd.f32 %v1791_v14, %v1790_v7  ;;  %v4633_v14 = vld [vmem:[%s7541_s11 + $0x38] sm:$0xff] }
 0x2e7   :  { %5332 = vmatmul.mubr.msk.f32.gmra.mrb[38].mxu1 %vm632_vm8, %v1450_v8  ;;  %5365 = vmatmul.mubr.msk.f32.gmra.mrb[46].mxu0 %vm632_vm8, %v1450_v8 }
 0x2e8   :  { %5373 = vmatprep.mubr.msk.f32.mxu1 %vm805_vm9, %v6706_v4  ;;  %5397 = vmatprep.mubr.msk.f32.mxu0 %vm6213_vm1, %v6214_v11  ;;  %v1777_v4 = vld [vmem:[%s7578_s25] sm:$0xff]  ;;  %v1802_v18 = vrot.slane %v1801_v13, 4  ;;  %v1793_v32 = vrot.slane %v1792_v22, 2 }
 0x2ea   :  { %v1803_v19 = vadd.f32 %v1802_v18, %v1801_v13  ;;  %v1794_v41 = vadd.f32 %v1793_v32, %v1792_v22  ;;  %v4632_v13 = vld [vmem:[%s7541_s11 + $0x30] sm:$0xff]  ;;  %v4635_v22 = vld [vmem:[%s7541_s11 + $0x48] sm:$0xff]  ;;  %v4637_v32 = vld [vmem:[%s7541_s11 + $0x58] sm:$0xff] }
 0x2eb   :  { %v2172_v18 = vld [vmem:[%s7541_s11 + $0x10] sm:$0xff] }
 0x2ec   :  { %v1804_v40 = vrot.slane %v1803_v19, 2 }
 0x2ee   :  { %v1805_v8 = vadd.f32 %v1804_v40, %v1803_v19 }
 0x3b2   :  { %v1526_v16 = vpop.f32.mrb[34].mxu1  ;;  %v1606_v28 = vpop.f32.mrb[42].mxu0 }
 0x3b3   :  { %v1620_v51 = vmax.f32 %v1526_v16, %v1606_v28  ;;  %v5327_v15 = vpop.f32.mrb[35].mxu1  ;;  %v5360_v36 = vpop.f32.mrb[43].mxu0 }
 0x3b6   :  { %v1531_v52 = vpop.f32.mrb[36].mxu1  ;;  %v1611_v6 = vpop.f32.mrb[44].mxu0 }
 0x3b7   :  { %v1621_v17 = vmax.f32 %v1531_v52, %v1611_v6  ;;  %v5330_v53 = vpop.f32.mrb[37].mxu1  ;;  %v5363_v38 = vpop.f32.mrb[45].mxu0  ;;  %v1806_v52 = vrot.slane %v1805_v8, 1 }
 0x3b9   :  { %v5941_v55 = vpack.c.bf16 %v1621_v17, %v1620_v51  ;;  %v1795_v51 = vrot.slane %v1794_v41, 1 }
 0x3ba   :  { %v1536_v23 = vpop.f32.mrb[38].mxu1  ;;  %v1616_v56 = vpop.f32.mrb[46].mxu0 }
 0x3bb   :  { %v1622_v12 = vmax.f32 %v1536_v23, %v1616_v56  ;;  %v5333_v57 = vpop.f32.mrb[39].mxu1  ;;  %v5366_v58 = vpop.f32.mrb[47].mxu0  ;;  %5942 = vmatprep.subr.bf16.mxu1 %v5941_v55  ;;  %v1796_v53 = vadd.f32 %v1795_v51, %v1794_v41  ;;  %v1807_v56 = vadd.f32 %v1806_v52, %v1805_v8 }
 0x3bc   :  { %5944 = vmatpush3.bf16.msra.mxu1 %v5941_v55  ;;  %v1783_v58 = vld [vmem:[%s7538_s8] sm:$0xf] }
 0x3bd   :  { %5371 = vmatprep.subr.mxu1 %v1622_v12 }
 0x3c0   :  { %5372 = vmatpush3.msra.mxu1 %v1622_v12 }
 0x3c1   :  { %5946 = vmatprep.subr.bf16.mxu1 %v5941_v55  ;;  %5374 = vmatmul.mubr.msk.f32.vlgmr.msra.gmra.mrb[40].mxu1 %vm805_vm9, %v6805_v48  ;;  %v1778_v48 = vld [vmem:[%s7578_s25 + $0x8] sm:$0xff] }
 0x3c2   :  { %5948 = vmatpush3.bf16.msra.mxu1 %v5941_v55  ;;  %5382 = vmatprep.mubr.msk.f32.mxu1 %vm805_vm9, %v6810_v49  ;;  %v5950_v59 = vpack.c.bf16 %v1778_v48, %v1777_v4  ;;  %v1779_v49 = vld [vmem:[%s7578_s25 + $0x10] sm:$0xff]  ;;  %v2170_v4 = vld [vmem:[%s7541_s11] sm:$0xff]  ;;  %v2171_v48 = vld [vmem:[%s7541_s11 + $0x8] sm:$0xff] }
 0x3c3   :  { %5380 = vmatprep.subr.mxu1 %v1622_v12 }
 0x3c4   :  { %5951 = vmatpush3.bf16.msra.mxu0 %v5950_v59 }
 0x3c5   :  { %5952 = vmatprep.subr.bf16.mxu0 %v6212_v3 }
 0x3c6   :  { %5381 = vmatpush3.msra.mxu1 %v1622_v12 }
 0x3c7   :  { %5383 = vmatmul.mubr.msk.f32.vlgmr.msra.gmra.mrb[42].mxu1 %vm805_vm9, %v6819_v50  ;;  %5958 = vmatprep.subr.bf16.mxu1 %v6212_v3  ;;  %v1780_v50 = vld [vmem:[%s7578_s25 + $0x18] sm:$0xff]  ;;  %s4537_s25 = sshll.u32 %s6216_s4, 4  ;;  %s4538_s25 = int_to_ptr.vmem [resolvable:$true] %s4537_s25 }
 0x3c8   :  { %5412 = vmatprep.mubr.msk.f32.mxu1 %vm6213_vm1, %v6214_v11  ;;  %5960 = vmatpush3.bf16.msra.mxu1 %v5950_v59  ;;  %v5953_v60 = vpack.c.bf16 %v1780_v50, %v1779_v49  ;;  %v6994_v59 = vpack.c.bf16 %v2171_v48, %v2170_v4  ;;  %v4642_v48 = vld [vmem:[%s7541_s11 + $0x70] sm:$0xff]  ;;  %s6188_s5 = scalar_lea.vmem %s4538_s25, 32  ;;  %p6193_p1 = scmp.lt.s32.totalorder %s4538_s25, %s4538_s25 }
 0x3c9   :  { %5961 = vmatprep.subr.bf16.mxu1 %v6212_v3  ;;  %p6189_p0 = scmp.ne.s32.totalorder %s4538_s25, %s6188_s5  ;;  %p6194_p2 = scmp.lt.s32.totalorder %s6188_s5, %s6188_s5 }
 0x3ca   :  { %5954 = vmatpush3.bf16.msra.mxu0 %v5953_v60 }
 0x3cb   :  { %5955 = vmatprep.subr.bf16.mxu0 %v6212_v3  ;;  %p6195_p3 = por %p6194_p2, %p6193_p1 }
 0x3cc   :  { %5963 = vmatpush3.bf16.msra.mxu1 %v5953_v60 }
 0x3cd   :  { %5964 = vmatprep.subr.bf16.mxu1 %v6212_v3  ;;  %p6196_p4 = pnand %p6195_p3, %p6189_p0 }
 0x3ce   :  { %5957 = vmatpush3.bf16.msra.mxu0 %v5956_v62 }
 0x3cf   :  { %5415 = vmatprep.subr.mxu0 %v6214_v11 }
 0x3d0   :  { %5966 = vmatpush3.bf16.msra.mxu1 %v5956_v62 }
 0x3d1   :  { %5976 = vmatprep.subr.bf16.mxu1 %v6212_v3 }
 0x494   :  { %v5375_v5 = vpop.f32.mrb[40].mxu1 }
 0x495   :  { %v1689_v35 = vpop.f32.mrb[41].mxu1 }
 0x49a   :  { %v5384_v47 = vpop.f32.mrb[42].mxu1 }
 0x49b   :  { %v1774_v20 = vmax.f32 %v5375_v5, %v5384_v47  ;;  %v1764_v54 = vpop.f32.mrb[43].mxu1  ;;  %v1785_v5 = vld [vmem:[%s7540_s10] sm:$0x1]  ;;  %v7016_v47 = vpack.c.bf16 %v4633_v14, %v4632_v13 }
 0x49c   :  { %v1773_v21 = vmax.f32 %v1689_v35, %v1764_v54  ;;  %v4654_v14 = vld [vmem:[%s7541_s11 + $0xc0] sm:$0xff] }
 0x49d   :  { %v6963_v24 = vmax.f32 %v1774_v20, 0.0  ;;  %v2173_v20 = vld [vmem:[%s7541_s11 + $0x18] sm:$0xff] }
 0x49e   :  { %v6965_v9 = vmax.f32 %v1773_v21, 0.0  ;;  %v7024_v54 = vpack.c.bf16 %v2173_v20, %v2172_v18  ;;  %v4634_v21 = vld [vmem:[%s7541_s11 + $0x40] sm:$0xff]  ;;  %v4655_v18 = vld [vmem:[%s7541_s11 + $0xc8] sm:$0xff] }
 0x49f   :  { %v1809_v25 = vsel %vm1788_vm10, %v6963_v24, 0.0  ;;  %v1819_v27 = vmul.f32 %v6963_v24, %v6963_v24  ;;  %v7035_v19 = vpack.c.bf16 %v4635_v22, %v4634_v21  ;;  %v7148_v20 = vpack.c.bf16 %v4655_v18, %v4654_v14  ;;  %v4656_v21 = vld [vmem:[%s7541_s11 + $0xd0] sm:$0xff]  ;;  %v4657_v22 = vld [vmem:[%s7541_s11 + $0xd8] sm:$0xff] }
 0x4a0   :  { %v1808_v29 = vsel %vm1786_vm11, %v6965_v9, 0.0  ;;  %v1818_v30 = vmul.f32 %v6965_v9, %v6965_v9 }
 0x4a1   :  { %v1821_v34 = vsel %vm1788_vm10, %v1819_v27, 0.0  ;;  %v1810_v37 = vadd.f32 %v1809_v25, %v1808_v29  ;;  %v2174_v25 = vld [vmem:[%s7541_s11 + $0x20] sm:$0xff]  ;;  %v2175_v27 = vld [vmem:[%s7541_s11 + $0x28] sm:$0xff] }
 0x4a2   :  { %v1820_v33 = vsel %vm1786_vm11, %v1818_v30, 0.0  ;;  %v7044_v29 = vpack.c.bf16 %v2175_v27, %v2174_v25  ;;  %v4636_v30 = vld [vmem:[%s7541_s11 + $0x50] sm:$0xff]  ;;  %v7161_v25 = vpack.c.bf16 %v4657_v22, %v4656_v21  ;;  %v4658_v27 = vld [vmem:[%s7541_s11 + $0xe0] sm:$0xff] }
 0x4a3   :  { %v1811_v42 = vrot.slane %v1810_v37, 4  ;;  %v1822_v43 = vadd.f32 %v1821_v34, %v1820_v33  ;;  %v7055_v34 = vpack.c.bf16 %v4637_v32, %v4636_v30  ;;  %v4659_v30 = vld [vmem:[%s7541_s11 + $0xe8] sm:$0xff] }
 0x4a4   :  { %v7173_v32 = vpack.c.bf16 %v4659_v30, %v4658_v27  ;;  %v7298_v27 = vld [vmem:[%s7545_s15] sm:$0xf] }
 0x4a5   :  { %v1812_v44 = vadd.f32 %v1811_v42, %v1810_v37  ;;  %v1823_v46 = vrot.slane %v1822_v43, 4  ;;  %v2135_v37 = vlaneseq  ;;  %v7308_v30 = vld [vmem:[%s7546_s16] sm:$0xf] }
 0x4a7   :  { %v1813_v16 = vrot.slane %v1812_v44, 2  ;;  %v1824_v28 = vadd.f32 %v1823_v46, %v1822_v43  ;;  %v2136_v33 = vshrl.u32 %v2135_v37, 7  ;;  %v4648_v46 = vld [vmem:[%s7541_s11 + $0x98] sm:$0xff]  ;;  %v2160_v37 = vld [vmem:[%s7544_s14] sm:$0xff] }
 0x4a9   :  { %v1814_v15 = vadd.f32 %v1813_v16, %v1812_v44  ;;  %v1825_v36 = vrot.slane %v1824_v28, 2  ;;  %v7060_v40 = vsub.s32 0, %v2136_v33  ;;  %v4647_v44 = vld [vmem:[%s7541_s11 + $0x90] sm:$0xff]  ;;  %v2161_v33 = vld [vmem:[%s7544_s14 + $0x8] sm:$0xff] }
 0x4ab   :  { %v1815_v6 = vrot.slane %v1814_v15, 1  ;;  %v1826_v17 = vadd.f32 %v1825_v36, %v1824_v28  ;;  %v4640_v28 = vld [vmem:[%s7541_s11 + $0x60] sm:$0xff] }
 0x4ad   :  { %v1816_v38 = vadd.f32 %v1815_v6, %v1814_v15  ;;  %v1827_v55 = vrot.slane %v1826_v17, 1 }
 0x4af   :  { %v1817_v23 = vadd.f32 %v1816_v38, %v1796_v53  ;;  %v1828_v12 = vadd.f32 %v1827_v55, %v1826_v17  ;;  %v4641_v17 = vld [vmem:[%s7541_s11 + $0x68] sm:$0xff] }
 0x4b0   :  { %v4650_v53 = vld [vmem:[%s7541_s11 + $0xa8] sm:$0xff] }
 0x4b1   :  { %5398 = vmatmul.mubr.msk.f32.vlgmr.msra.gmra.mrb[48].mxu0 %vm1786_vm11, %v1817_v23  ;;  %v1829_v57 = vadd.f32 %v1828_v12, %v1807_v56  ;;  %v7092_v23 = vpack.c.bf16 %v4641_v17, %v4640_v28  ;;  %v2157_v17 = vld [vmem:[%s7543_s13 + $0x28] sm:$0xff] }
 0x4b2   :  { %5417 = vmatprep.mubr.msk.f32.mxu0 %vm6213_vm1, %v6214_v11  ;;  %5416 = vmatpush3.msk.msra.mxu0 %vm136_vm0, %v1783_v58 }
 0x4b3   :  { %5413 = vmatmul.mubr.msk.f32.vlgmr.msra.gmra.mrb[44].mxu1 %vm1786_vm11, %v1829_v57  ;;  %5420 = vmatprep.subr.mxu0 %v6214_v11 }
 0x4b4   :  { %5452 = vmatprep.mubr.msk.f32.mxu1 %vm6213_vm1, %v6214_v11  ;;  %5978 = vmatpush3.bf16.msra.mxu1 %v6994_v59 }
 0x4b5   :  { %5979 = vmatprep.subr.bf16.mxu1 %v6212_v3 }
 0x4b8   :  { %5981 = vmatpush3.bf16.msra.mxu1 %v7024_v54 }
 0x4b9   :  { %5982 = vmatprep.subr.bf16.mxu1 %v6212_v3 }
 0x4bc   :  { %5984 = vmatpush3.bf16.msra.mxu1 %v7044_v29 }
 0x4bd   :  { %5994 = vmatprep.subr.bf16.mxu1 %v6212_v3 }
 0x584   :  { %v1899_v49 = vpop.f32.mrb[48].mxu0 }
 0x585   :  { %v1903_v50 = vmul.f32 0.0034722222, %v1899_v49  ;;  %v5399_v60 = vpop.f32.mrb[49].mxu0  ;;  %v4643_v49 = vld [vmem:[%s7541_s11 + $0x78] sm:$0xff] }
 0x586   :  { %v1973_v31 = vpop.f32.mrb[44].mxu1 }
 0x587   :  { %v1978_v61 = vmul.f32 %v1903_v50, %v1903_v50  ;;  %v1977_v62 = vmul.f32 0.0034722222, %v1973_v31  ;;  %v5414_v0 = vpop.f32.mrb[45].mxu1 }
 0x588   :  { %v4651_v0 = vld [vmem:[%s7541_s11 + $0xb0] sm:$0xff] }
 0x589   :  { %v1979_v1 = vsub.f32 %v1977_v62, %v1978_v61 }
 0x58b   :  { %v1980_v10 = vadd.f32 1e-05, %v1979_v1  ;;  %v4652_v1 = vld [vmem:[%s7541_s11 + $0xb8] sm:$0xff] }
 0x58d   :  { %6184 = vrsqrt.f32 %v1980_v10 }
 0x597   :  { %v6185_v2 = vpop.eup %6184 }
 0x598   :  { %v1982_v45 = vmul.f32 %v6185_v2, %v1784_v26 }
 0x59a   :  { %5418 = vmatmul.mubr.msk.f32.vlgmr.msra.gmra.mrb[50].mxu0 %vm1985_vm12, %v1982_v45  ;;  %v1983_v7 = vmul.f32 %v1982_v45, %v1903_v50  ;;  %v7119_v45 = vpack.c.bf16 %v4643_v49, %v4642_v48 }
 0x59b   :  { %5421 = vmatpush3.msk.msra.mxu0 %vm136_vm0, %v1783_v58  ;;  %5422 = vmatprep.mubr.msk.f32.mxu0 %vm6213_vm1, %v6214_v11 }
 0x59c   :  { %v1984_v35 = vsub.f32 %v1785_v5, %v1983_v7  ;;  %5967 = vmatprep.subr.bf16.mxu0 %v6212_v3  ;;  %v7125_v5 = vpack.c.bf16 %v4652_v1, %v4651_v0  ;;  %v4644_v7 = vld [vmem:[%s7541_s11 + $0x80] sm:$0xff] }
 0x59e   :  { %5423 = vmatmul.mubr.msk.f32.vlgmr.msra.gmra.mrb[52].mxu0 %vm1985_vm12, %v1984_v35  ;;  %v4645_v35 = vld [vmem:[%s7541_s11 + $0x88] sm:$0xff] }
 0x59f   :  { %5437 = vmatprep.mubr.msk.f32.mxu0 %vm6213_vm1, %v6214_v11  ;;  %5969 = vmatpush3.bf16.msra.mxu0 %v7016_v47  ;;  %v7135_v13 = vpack.c.bf16 %v4645_v35, %v4644_v7 }
 0x5a0   :  { %5970 = vmatprep.subr.bf16.mxu0 %v6212_v3 }
 0x5a3   :  { %5972 = vmatpush3.bf16.msra.mxu0 %v7035_v19 }
 0x5a4   :  { %5973 = vmatprep.subr.bf16.mxu0 %v6212_v3 }
 0x5a7   :  { %5975 = vmatpush3.bf16.msra.mxu0 %v7055_v34 }
 0x5a8   :  { %5985 = vmatprep.subr.bf16.mxu0 %v6212_v3 }
 0x66d   :  { %v2058_v42 = vpop.f32.mrb[50].mxu0 }
 0x66e   :  { %v2138_v43 = vrot.slane %v2058_v42, %v7060_v40  ;;  %v5419_v41 = vpop.f32.mrb[51].mxu0  ;;  %v7187_v42 = vpack.c.bf16 %v2161_v33, %v2160_v37 }
 0x66f   :  { %v2153_v41 = vld [vmem:[%s7543_s13 + $0x8] sm:$0xff] }
 0x670   :  { %v2139_v8 = vmul.f32 %v2138_v43, %v6951_v39  ;;  %v2140_v51 = vmul.f32 %v2138_v43, %v6946_v63  ;;  %v2147_v15 = vmul.f32 %v2138_v43, %v6965_v9  ;;  %v2148_v36 = vmul.f32 %v2138_v43, %v6963_v24  ;;  %v4649_v39 = vld [vmem:[%s7541_s11 + $0xa0] sm:$0xff] }
 0x671   :  { %v2131_v16 = vpop.f32.mrb[52].mxu0  ;;  %v7086_v63 = vpack.c.bf16 %v4648_v46, %v4647_v44  ;;  %v7094_v56 = vpack.c.bf16 %v4650_v53, %v4649_v39  ;;  %v2152_v43 = vld [vmem:[%s7543_s13] sm:$0xff]  ;;  %v2162_v46 = vld [vmem:[%s7544_s14 + $0x10] sm:$0xff] }
 0x672   :  { %v2144_v52 = vrot.slane %v2131_v16, %v7060_v40  ;;  %v5424_v6 = vpop.f32.mrb[53].mxu0  ;;  %v7195_v44 = vpack.c.bf16 %v2153_v41, %v2152_v43  ;;  %v2154_v16 = vld [vmem:[%s7543_s13 + $0x10] sm:$0xff] }
 0x673   :  { %v2156_v6 = vld [vmem:[%s7543_s13 + $0x20] sm:$0xff] }
 0x674   :  { %v2145_v9 = vadd.f32 %v2144_v52, %v2139_v8  ;;  %v2146_v38 = vadd.f32 %v2144_v52, %v2140_v51  ;;  %v7088_v24 = vadd.f32 %v2147_v15, %v2144_v52  ;;  %v7090_v55 = vadd.f32 %v2148_v36, %v2144_v52  ;;  %v2163_v8 = vld [vmem:[%s7544_s14 + $0x18] sm:$0xff]  ;;  %v2164_v15 = vld [vmem:[%s7544_s14 + $0x20] sm:$0xff]  ;;  %v2165_v36 = vld [vmem:[%s7544_s14 + $0x28] sm:$0xff] }
 0x675   :  { %v7209_v28 = vpack.c.bf16 %v2163_v8, %v2162_v46  ;;  %v2155_v51 = vld [vmem:[%s7543_s13 + $0x18] sm:$0xff]  ;;  %v7230_v39 = vpack.c.bf16 %v2165_v36, %v2164_v15  ;;  %v6019_v53 = vpack.c.bf16 %v2157_v17, %v2156_v6 }
 0x676   :  { %5453 = vmatmul.mubr.msk.f32.vlgmr.msra.gmra.mrb[46].mxu1 %vm1786_vm11, %v2145_v9  ;;  %v2185_v12 = vrot.slane %v2145_v9, 1  ;;  %v2186_v57 = vrot.slane %v2146_v38, 1  ;;  %v2422_v58 = vrot.slane %v2145_v9, 3  ;;  %v2423_v4 = vrot.slane %v2146_v38, 3 }
 0x677   :  { %5996 = vmatpush3.bf16.msra.mxu1 %v7086_v63  ;;  %5482 = vmatprep.mubr.msk.f32.mxu1 %vm6213_vm1, %v6214_v11  ;;  %v2339_v50 = vrot.slane %v2145_v9, 2  ;;  %v2340_v60 = vrot.slane %v2146_v38, 2  ;;  %v2505_v31 = vrot.slane %v2145_v9, 4  ;;  %v2506_v61 = vrot.slane %v2146_v38, 4  ;;  %v2166_v9 = vld [vmem:[%s7544_s14 + $0x30] sm:$0xff]  ;;  %v2167_v38 = vld [vmem:[%s7544_s14 + $0x38] sm:$0xff] }
 0x678   :  { %v2187_v62 = vsel %vm121_vm4, %v2185_v12, %v2186_v57  ;;  %5997 = vmatprep.subr.bf16.mxu1 %v6212_v3  ;;  %v2424_v10 = vsel %vm419_vm7, %v2422_v58, %v2423_v4  ;;  %v7221_v52 = vpack.c.bf16 %v2155_v51, %v2154_v16  ;;  %v7244_v12 = vpack.c.bf16 %v2167_v38, %v2166_v9  ;;  %v2158_v57 = vld [vmem:[%s7543_s13 + $0x30] sm:$0xff]  ;;  %v2159_v58 = vld [vmem:[%s7543_s13 + $0x38] sm:$0xff] }
 0x679   :  { %5438 = vmatmul.mubr.msk.f32.vlgmr.msra.gmra.mrb[54].mxu0 %vm1786_vm11, %v2187_v62  ;;  %v2341_v26 = vsel %vm314_vm6, %v2339_v50, %v2340_v60  ;;  %v2507_v2 = vsel %vm136_vm0, %v2505_v31, %v2506_v61  ;;  %v6022_v4 = vpack.c.bf16 %v2159_v58, %v2158_v57  ;;  %v2884_v43 = vrot.slane %v7088_v24, 1 }
 0x67a   :  { %5987 = vmatpush3.bf16.msra.mxu0 %v7092_v23  ;;  %5467 = vmatprep.mubr.msk.f32.mxu0 %vm6213_vm1, %v6214_v11  ;;  %v2885_v41 = vrot.slane %v7090_v55, 1  ;;  %v3032_v46 = vrot.slane %v7090_v55, 2 }
 0x67b   :  { %5999 = vmatpush3.bf16.msra.mxu1 %v7094_v56  ;;  %5988 = vmatprep.subr.bf16.mxu0 %v6212_v3 }
 0x67c   :  { %6000 = vmatprep.subr.bf16.mxu1 %v6212_v3 }
 0x67e   :  { %5990 = vmatpush3.bf16.msra.mxu0 %v7119_v45 }
 0x67f   :  { %6002 = vmatpush3.bf16.msra.mxu1 %v7125_v5  ;;  %5991 = vmatprep.subr.bf16.mxu0 %v6212_v3 }
 0x680   :  { %6012 = vmatprep.subr.bf16.mxu1 %v6212_v3 }
 0x682   :  { %5993 = vmatpush3.bf16.msra.mxu0 %v7135_v13  ;;  %5483 = vmatmul.mubr.msk.f32.vlgmr.msra.gmra.mrb[48].mxu1 %vm1786_vm11, %v2424_v10 }
 0x683   :  { %6003 = vmatprep.subr.bf16.mxu0 %v6212_v3  ;;  %5516 = vmatprep.mubr.msk.f32.mxu1 %vm6213_vm1, %v6214_v11 }
 0x684   :  { %6014 = vmatpush3.bf16.msra.mxu1 %v7195_v44 }
 0x685   :  { %5468 = vmatmul.mubr.msk.f32.vlgmr.msra.gmra.mrb[56].mxu0 %vm1786_vm11, %v2341_v26  ;;  %6015 = vmatprep.subr.bf16.mxu1 %v6212_v3 }
 0x686   :  { %6005 = vmatpush3.bf16.msra.mxu0 %v7148_v20  ;;  %5497 = vmatprep.mubr.msk.f32.mxu0 %vm6213_vm1, %v6214_v11 }
 0x687   :  { %6006 = vmatprep.subr.bf16.mxu0 %v6212_v3 }
 0x688   :  { %6017 = vmatpush3.bf16.msra.mxu1 %v7221_v52 }
 0x689   :  { %6018 = vmatprep.subr.bf16.mxu1 %v6212_v3 }
 0x68a   :  { %6008 = vmatpush3.bf16.msra.mxu0 %v7161_v25 }
 0x68b   :  { %6009 = vmatprep.subr.bf16.mxu0 %v6212_v3 }
 0x68c   :  { %6020 = vmatpush3.bf16.msra.mxu1 %v6019_v53 }
 0x68d   :  { %6021 = vmatprep.subr.bf16.mxu1 %v6212_v3 }
 0x68e   :  { %6011 = vmatpush3.bf16.msra.mxu0 %v7173_v32 }
 0x68f   :  { %6024 = vmatprep.subr.bf16.mxu0 %v6212_v3 }
 0x690   :  { %6023 = vmatpush3.bf16.msra.mxu1 %v6022_v4 }
 0x691   :  { %5498 = vmatmul.mubr.msk.f32.vlgmr.msra.gmra.mrb[58].mxu0 %vm1786_vm11, %v2507_v2  ;;  %5538 = vmatprep.subr.mxu1 %v6214_v11  ;;  %v7258_v2 = vld [vmem:[%s7542_s12] ss:$0 sm:$0xff] }
 0x692   :  { %5535 = vmatprep.mubr.msk.f32.mxu0 %vm6213_vm1, %v6214_v11  ;;  %6026 = vmatpush3.bf16.msra.mxu0 %v7187_v42 }
 0x693   :  { %6027 = vmatprep.subr.bf16.mxu0 %v6212_v3 }
 0x696   :  { %6029 = vmatpush3.bf16.msra.mxu0 %v7209_v28 }
 0x697   :  { %6030 = vmatprep.subr.bf16.mxu0 %v6212_v3 }
 0x69a   :  { %6032 = vmatpush3.bf16.msra.mxu0 %v7230_v39 }
 0x69b   :  { %6033 = vmatprep.subr.bf16.mxu0 %v6212_v3 }
 0x69e   :  { %6035 = vmatpush3.bf16.msra.mxu0 %v7244_v12 }
 0x69f   :  { %6045 = vmatprep.subr.bf16.mxu0 %v6212_v3 }
 0x749   :  { %v2328_v48 = vpop.f32.mrb[46].mxu1 }
 0x74a   :  { %v5454_v49 = vpop.f32.mrb[47].mxu1 }
 0x74c   :  { %v2256_v50 = vpop.f32.mrb[54].mxu0 }
 0x74d   :  { %v2329_v60 = vadd.f32 %v2328_v48, %v2256_v50  ;;  %v5439_v31 = vpop.f32.mrb[55].mxu0  ;;  %v3547_v48 = vld [vmem:[%s7547_s17 + $0x8] sm:$0xff]  ;;  %v3548_v50 = vld [vmem:[%s7547_s17 + $0x10] sm:$0xff] }
 0x755   :  { %v2493_v61 = vpop.f32.mrb[48].mxu1 }
 0x756   :  { %v5484_v62 = vpop.f32.mrb[49].mxu1 }
 0x758   :  { %v2410_v0 = vpop.f32.mrb[56].mxu0 }
 0x759   :  { %v2414_v1 = vadd.f32 %v2410_v0, %v2329_v60  ;;  %v5469_v10 = vpop.f32.mrb[57].mxu0  ;;  %v3549_v60 = vld [vmem:[%s7547_s17 + $0x18] sm:$0xff] }
 0x75a   :  { %v6109_v31 = vpack.c.bf16 %v3549_v60, %v3548_v50  ;;  %v3903_v50 = vld [vmem:[%s7551_s21 + $0x10] sm:$0xff]  ;;  %v3904_v60 = vld [vmem:[%s7551_s21 + $0x18] sm:$0xff] }
 0x75b   :  { %v2497_v26 = vadd.f32 %v2493_v61, %v2414_v1 }
 0x764   :  { %v2576_v7 = vpop.f32.mrb[58].mxu0 }
 0x765   :  { %v2580_v35 = vadd.f32 %v2576_v7, %v2497_v26  ;;  %v5499_v14 = vpop.f32.mrb[59].mxu0 }
 0x767   :  { %v2587_v18 = vadd.f32 %v7258_v2, %v2580_v35 }
 0x769   :  { %5517 = vmatmul.mubr.msk.f32.vlgmr.msra.gmra.mrb[50].mxu1 %vm2588_vm13, %v2587_v18  ;;  %5536 = vmatmul.mubr.msk.f32.vlgmr.msra.gmra.mrb[60].mxu0 %vm2588_vm13, %v2587_v18 }
 0x76a   :  { %6047 = vmatpush3.bf16.msra.mxu0 %v6994_v59  ;;  %5575 = vmatprep.mubr.msk.f32.mxu0 %vm6213_vm1, %v6214_v11  ;;  %v3107_v59 = vrot.slane %v7088_v24, 3 }
 0x76b   :  { %6048 = vmatprep.subr.bf16.mxu0 %v6212_v3  ;;  %5540 = vmatprep.mubr.msk.f32.mxu1 %vm6213_vm1, %v6214_v11 }
 0x76e   :  { %6050 = vmatpush3.bf16.msra.mxu0 %v7024_v54  ;;  %v3108_v54 = vrot.slane %v7090_v55, 3 }
 0x76f   :  { %6051 = vmatprep.subr.bf16.mxu0 %v6212_v3 }
 0x772   :  { %6053 = vmatpush3.bf16.msra.mxu0 %v7044_v29  ;;  %v3109_v29 = vsel %vm419_vm7, %v3107_v59, %v3108_v54 }
 0x773   :  { %6063 = vmatprep.subr.bf16.mxu0 %v6212_v3 }
 0x775   :  { %5576 = vmatmul.mubr.msk.f32.vlgmr.msra.gmra.mrb[62].mxu0 %vm1786_vm11, %v7088_v24 }
 0x776   :  { %6065 = vmatpush3.bf16.msra.mxu0 %v7086_v63  ;;  %5605 = vmatprep.mubr.msk.f32.mxu0 %vm6213_vm1, %v6214_v11 }
 0x777   :  { %6066 = vmatprep.subr.bf16.mxu0 %v6212_v3 }
 0x77a   :  { %6068 = vmatpush3.bf16.msra.mxu0 %v7094_v56 }
 0x77b   :  { %6069 = vmatprep.subr.bf16.mxu0 %v6212_v3 }
 0x77e   :  { %6071 = vmatpush3.bf16.msra.mxu0 %v7125_v5 }
 0x77f   :  { %6081 = vmatprep.subr.bf16.mxu0 %v6212_v3 }
 0x781   :  { %5606 = vmatmul.mubr.msk.f32.vlgmr.msra.gmra.mrb[64].mxu0 %vm1786_vm11, %v3109_v29 }
 0x782   :  { %6083 = vmatpush3.bf16.msra.mxu0 %v7195_v44  ;;  %5639 = vmatprep.mubr.msk.f32.mxu0 %vm6213_vm1, %v6214_v11 }
 0x783   :  { %6084 = vmatprep.subr.bf16.mxu0 %v6212_v3 }
 0x786   :  { %6086 = vmatpush3.bf16.msra.mxu0 %v7221_v52 }
 0x787   :  { %6087 = vmatprep.subr.bf16.mxu0 %v6212_v3 }
 0x78a   :  { %6089 = vmatpush3.bf16.msra.mxu0 %v6019_v53 }
 0x78b   :  { %6090 = vmatprep.subr.bf16.mxu0 %v6212_v3 }
 0x78e   :  { %6092 = vmatpush3.bf16.msra.mxu0 %v6022_v4  ;;  %v3546_v4 = vld [vmem:[%s7547_s17] sm:$0xff] }
 0x78f   :  { %5661 = vmatprep.subr.mxu0 %v6214_v11  ;;  %v6106_v49 = vpack.c.bf16 %v3547_v48, %v3546_v4  ;;  %v3901_v4 = vld [vmem:[%s7551_s21] sm:$0xff]  ;;  %v3902_v48 = vld [vmem:[%s7551_s21 + $0x8] sm:$0xff] }
 0x83c   :  { %v2658_v63 = vpop.f32.mrb[50].mxu1  ;;  %v2728_v56 = vpop.f32.mrb[60].mxu0 }
 0x83d   :  { %v2732_v5 = vmax.f32 %v2658_v63, %v2728_v56  ;;  %v5518_v21 = vpop.f32.mrb[51].mxu1  ;;  %v5537_v22 = vpop.f32.mrb[61].mxu0 }
 0x83f   :  { %5539 = vmatpush3.msra.mxu1 %v2732_v5 }
 0x840   :  { %5541 = vmatmul.mubr.msk.f32.vlgmr.msra.gmra.mrb[52].mxu1 %vm2733_vm14, %v7298_v27  ;;  %5543 = vmatprep.subr.mxu1 %v6214_v11 }
 0x841   :  { %5544 = vmatpush3.msra.mxu1 %v2732_v5  ;;  %5545 = vmatprep.mubr.msk.f32.mxu1 %vm6213_vm1, %v6214_v11 }
 0x842   :  { %6036 = vmatprep.subr.bf16.mxu1 %v6212_v3 }
 0x844   :  { %5546 = vmatmul.mubr.msk.f32.vlgmr.msra.gmra.mrb[54].mxu1 %vm2733_vm14, %v7308_v30 }
 0x845   :  { %6038 = vmatpush3.bf16.msra.mxu1 %v7016_v47  ;;  %5560 = vmatprep.mubr.msk.f32.mxu1 %vm6213_vm1, %v6214_v11  ;;  %v2886_v47 = vsel %vm121_vm4, %v2884_v43, %v2885_v41 }
 0x846   :  { %6039 = vmatprep.subr.bf16.mxu1 %v6212_v3 }
 0x848   :  { %v3027_v37 = vpop.f32.mrb[62].mxu0 }
 0x849   :  { %6041 = vmatpush3.bf16.msra.mxu1 %v7035_v19  ;;  %v5577_v33 = vpop.f32.mrb[63].mxu0 }
 0x84a   :  { %6042 = vmatprep.subr.bf16.mxu1 %v6212_v3 }
 0x84d   :  { %6044 = vmatpush3.bf16.msra.mxu1 %v7055_v34  ;;  %v3031_v34 = vrot.slane %v7088_v24, 2 }
 0x84e   :  { %6054 = vmatprep.subr.bf16.mxu1 %v6212_v3 }
 0x850   :  { %5561 = vmatmul.mubr.msk.f32.vlgmr.msra.gmra.mrb[56].mxu1 %vm1786_vm11, %v2886_v47 }
 0x851   :  { %6056 = vmatpush3.bf16.msra.mxu1 %v7092_v23  ;;  %5590 = vmatprep.mubr.msk.f32.mxu1 %vm6213_vm1, %v6214_v11  ;;  %v3033_v23 = vsel %vm314_vm6, %v3031_v34, %v3032_v46 }
 0x852   :  { %6057 = vmatprep.subr.bf16.mxu1 %v6212_v3 }
 0x854   :  { %v3178_v19 = vpop.f32.mrb[64].mxu0 }
 0x855   :  { %6059 = vmatpush3.bf16.msra.mxu1 %v7119_v45  ;;  %v5607_v44 = vpop.f32.mrb[65].mxu0  ;;  %v3183_v45 = vrot.slane %v7088_v24, 4 }
 0x856   :  { %6060 = vmatprep.subr.bf16.mxu1 %v6212_v3 }
 0x859   :  { %6062 = vmatpush3.bf16.msra.mxu1 %v7135_v13  ;;  %v3184_v13 = vrot.slane %v7090_v55, 4 }
 0x85a   :  { %6072 = vmatprep.subr.bf16.mxu1 %v6212_v3 }
 0x85b   :  { %v3185_v8 = vsel %vm136_vm0, %v3183_v45, %v3184_v13  ;;  %vm3586_vm0 = vcmask 261120  }
 0x85c   :  { %5591 = vmatmul.mubr.msk.f32.vlgmr.msra.gmra.mrb[58].mxu1 %vm1786_vm11, %v3033_v23 }
 0x85d   :  { %6074 = vmatpush3.bf16.msra.mxu1 %v7148_v20  ;;  %5620 = vmatprep.mubr.msk.f32.mxu1 %vm6213_vm1, %v6214_v11 }
 0x85e   :  { %6075 = vmatprep.subr.bf16.mxu1 %v6212_v3 }
 0x861   :  { %6077 = vmatpush3.bf16.msra.mxu1 %v7161_v25 }
 0x862   :  { %6078 = vmatprep.subr.bf16.mxu1 %v6212_v3 }
 0x865   :  { %6080 = vmatpush3.bf16.msra.mxu1 %v7173_v32 }
 0x866   :  { %6093 = vmatprep.subr.bf16.mxu1 %v6212_v3 }
 0x868   :  { %5621 = vmatmul.mubr.msk.f32.vlgmr.msra.gmra.mrb[60].mxu1 %vm1786_vm11, %v3185_v8 }
 0x869   :  { %6095 = vmatpush3.bf16.msra.mxu1 %v7187_v42  ;;  %5658 = vmatprep.mubr.msk.f32.mxu1 %vm6213_vm1, %v6214_v11 }
 0x86a   :  { %6096 = vmatprep.subr.bf16.mxu1 %v6212_v3 }
 0x86d   :  { %6098 = vmatpush3.bf16.msra.mxu1 %v7209_v28 }
 0x86e   :  { %6099 = vmatprep.subr.bf16.mxu1 %v6212_v3 }
 0x871   :  { %6101 = vmatpush3.bf16.msra.mxu1 %v7230_v39 }
 0x872   :  { %6102 = vmatprep.subr.bf16.mxu1 %v6212_v3 }
 0x875   :  { %6104 = vmatpush3.bf16.msra.mxu1 %v7244_v12 }
 0x876   :  { %6111 = vmatprep.subr.bf16.mxu1 %v6212_v3 }
 0x913   :  { %v2803_v24 = vpop.f32.mrb[52].mxu1 }
 0x914   :  { %v5542_v55 = vpop.f32.mrb[53].mxu1 }
 0x917   :  { %v2876_v20 = vpop.f32.mrb[54].mxu1 }
 0x918   :  { %v2880_v25 = vmax.f32 %v2803_v24, %v2876_v20  ;;  %v5547_v32 = vpop.f32.mrb[55].mxu1 }
 0x91a   :  { %v7392_v61 = vmax.f32 %v2880_v25, 0.0 }
 0x91c   :  { %v3561_v62 = vmul.f32 %v7392_v61, %v7392_v61  ;;  %v3554_v0 = vsel %vm3553_vm15, %v7392_v61, 0.0 }
 0x91d   :  { %v3555_v10 = vrot.slane %v3554_v0, 4 }
 0x91e   :  { %v3562_v1 = vsel %vm3553_vm15, %v3561_v62, 0.0 }
 0x91f   :  { %v3563_v7 = vrot.slane %v3562_v1, 4  ;;  %v3556_v35 = vadd.f32 %v3555_v10, %v3554_v0  ;;  %v4680_v10 = vld [vmem:[%s7551_s21 + $0x20] sm:$0xff] }
 0x921   :  { %v3564_v54 = vadd.f32 %v3563_v7, %v3562_v1  ;;  %v3557_v63 = vrot.slane %v3556_v35, 2 }
 0x923   :  { %v2955_v42 = vpop.f32.mrb[56].mxu1  ;;  %v3565_v21 = vrot.slane %v3564_v54, 2 }
 0x924   :  { %v3028_v16 = vadd.f32 %v3027_v37, %v2955_v42  ;;  %v5562_v51 = vpop.f32.mrb[57].mxu1  ;;  %v3550_v42 = vld [vmem:[%s7548_s18] sm:$0xff] }
 0x925   :  { %v3566_v43 = vadd.f32 %v3565_v21, %v3564_v54 }
 0x927   :  { %v3567_v46 = vrot.slane %v3566_v43, 1 }
 0x929   :  { %v3568_v55 = vadd.f32 %v3567_v46, %v3566_v43  ;;  %v4690_v43 = vld [vmem:[%s7551_s21 + $0x60] sm:$0xff]  ;;  %v4693_v46 = vld [vmem:[%s7551_s21 + $0x78] sm:$0xff] }
 0x92f   :  { %v3102_v15 = vpop.f32.mrb[58].mxu1 }
 0x930   :  { %v3106_v28 = vadd.f32 %v3102_v15, %v3028_v16  ;;  %v5592_v36 = vpop.f32.mrb[59].mxu1 }
 0x932   :  { %v3182_v52 = vadd.f32 %v3178_v19, %v3106_v28 }
 0x93b   :  { %v3254_v6 = vpop.f32.mrb[60].mxu1 }
 0x93c   :  { %v3258_v17 = vadd.f32 %v3254_v6, %v3182_v52  ;;  %v5622_v39 = vpop.f32.mrb[61].mxu1 }
 0x93e   :  { %v3259_v53 = vadd.f32 %v7258_v2, %v3258_v17 }
 0x940   :  { %5640 = vmatmul.mubr.msk.f32.vlgmr.msra.gmra.mrb[66].mxu0 %vm2588_vm13, %v3259_v53  ;;  %5659 = vmatmul.mubr.msk.f32.vlgmr.msra.gmra.mrb[62].mxu1 %vm2588_vm13, %v3259_v53  ;;  %v3551_v53 = vld [vmem:[%s7549_s19] sm:$0x1] }
 0x941   :  { %5663 = vmatprep.mubr.msk.f32.mxu0 %vm6213_vm1, %v6214_v11  ;;  %5690 = vmatprep.mubr.msk.f32.mxu1 %vm6213_vm1, %v6214_v11 }
 0x942   :  { %6113 = vmatpush3.bf16.msra.mxu1 %v6106_v49 }
 0x943   :  { %6114 = vmatprep.subr.bf16.mxu1 %v6212_v3 }
 0x946   :  { %6116 = vmatpush3.bf16.msra.mxu1 %v6109_v31 }
 0x947   :  { %5698 = vmatprep.subr.mxu1 %v6214_v11 }
 0xa13   :  { %v3329_v9 = vpop.f32.mrb[66].mxu0  ;;  %v3399_v38 = vpop.f32.mrb[62].mxu1 }
 0xa14   :  { %v3403_v12 = vmax.f32 %v3329_v9, %v3399_v38  ;;  %v5641_v57 = vpop.f32.mrb[67].mxu0  ;;  %v5660_v58 = vpop.f32.mrb[63].mxu1 }
 0xa16   :  { %5662 = vmatpush3.msra.mxu0 %v3403_v12 }
 0xa17   :  { %5664 = vmatmul.mubr.msk.f32.vlgmr.msra.gmra.mrb[68].mxu0 %vm2733_vm14, %v7298_v27  ;;  %5666 = vmatprep.subr.mxu0 %v6214_v11 }
 0xa18   :  { %5667 = vmatpush3.msra.mxu0 %v3403_v12  ;;  %5668 = vmatprep.mubr.msk.f32.mxu0 %vm6213_vm1, %v6214_v11  ;;  %v3552_v12 = vld [vmem:[%s7550_s20] sm:$0x1] }
 0xa19   :  { %6105 = vmatprep.subr.bf16.mxu0 %v6212_v3 }
 0xa1b   :  { %5669 = vmatmul.mubr.msk.f32.vlgmr.msra.gmra.mrb[70].mxu0 %vm2733_vm14, %v7308_v30  ;;  %v3558_v30 = vadd.f32 %v3557_v63, %v3556_v35 }
 0xa1c   :  { %5679 = vmatprep.mubr.msk.f32.mxu0 %vm6213_vm1, %v6214_v11  ;;  %6107 = vmatpush3.bf16.msra.mxu0 %v6106_v49  ;;  %v6118_v49 = vpack.c.bf16 %v3902_v48, %v3901_v4 }
 0xa1d   :  { %6108 = vmatprep.subr.bf16.mxu0 %v6212_v3  ;;  %v3559_v19 = vrot.slane %v3558_v30, 1 }
 0xa1f   :  { %v3560_v13 = vadd.f32 %v3559_v19, %v3558_v30  ;;  %v4687_v30 = vld [vmem:[%s7551_s21 + $0x50] sm:$0xff] }
 0xa20   :  { %6110 = vmatpush3.bf16.msra.mxu0 %v6109_v31  ;;  %v6121_v31 = vpack.c.bf16 %v3904_v60, %v3903_v50 }
 0xa21   :  { %5693 = vmatprep.subr.mxu0 %v6214_v11 }
 0xaea   :  { %v3470_v26 = vpop.f32.mrb[68].mxu0 }
 0xaeb   :  { %v5665_v2 = vpop.f32.mrb[69].mxu0 }
 0xaee   :  { %v3540_v14 = vpop.f32.mrb[70].mxu0 }
 0xaef   :  { %v3544_v18 = vmax.f32 %v3470_v26, %v3540_v14  ;;  %v5670_v59 = vpop.f32.mrb[71].mxu0  ;;  %v4681_v26 = vld [vmem:[%s7551_s21 + $0x28] sm:$0xff] }
 0xaf0   :  { %v6124_v59 = vpack.c.bf16 %v4681_v26, %v4680_v10 }
 0xaf1   :  { %v7399_v29 = vmax.f32 %v3544_v18, 0.0 }
 0xaf3   :  { %v3569_v56 = vsel %vm3553_vm15, %v7399_v29, 0.0  ;;  %v3577_v5 = vmul.f32 %v7399_v29, %v7399_v29 }
 0xaf4   :  { %v3570_v22 = vrot.slane %v3569_v56, 4 }
 0xaf5   :  { %v3578_v27 = vsel %vm3553_vm15, %v3577_v5, 0.0  ;;  %v4683_v5 = vld [vmem:[%s7551_s21 + $0x38] sm:$0xff] }
 0xaf6   :  { %v3571_v37 = vadd.f32 %v3570_v22, %v3569_v56  ;;  %v3579_v33 = vrot.slane %v3578_v27, 4  ;;  %v4682_v56 = vld [vmem:[%s7551_s21 + $0x30] sm:$0xff] }
 0xaf8   :  { %v3572_v41 = vrot.slane %v3571_v37, 2  ;;  %v3580_v47 = vadd.f32 %v3579_v33, %v3578_v27 }
 0xafa   :  { %v3573_v44 = vadd.f32 %v3572_v41, %v3571_v37  ;;  %v3581_v34 = vrot.slane %v3580_v47, 2  ;;  %v4688_v37 = vld [vmem:[%s7551_s21 + $0x58] sm:$0xff]  ;;  %v4691_v41 = vld [vmem:[%s7551_s21 + $0x68] sm:$0xff] }
 0xafb   :  { %v6133_v33 = vpack.c.bf16 %v4688_v37, %v4687_v30 }
 0xafc   :  { %v3574_v23 = vrot.slane %v3573_v44, 1  ;;  %v3582_v45 = vadd.f32 %v3581_v34, %v3580_v47  ;;  %v6136_v47 = vpack.c.bf16 %v4691_v41, %v4690_v43  ;;  %v4692_v34 = vld [vmem:[%s7551_s21 + $0x70] sm:$0xff] }
 0xafe   :  { %v3575_v8 = vadd.f32 %v3574_v23, %v3573_v44  ;;  %v3583_v24 = vrot.slane %v3582_v45, 1  ;;  %v6139_v23 = vpack.c.bf16 %v4693_v46, %v4692_v34 }
 0xb00   :  { %v3584_v20 = vadd.f32 %v3583_v24, %v3582_v45  ;;  %v3576_v25 = vadd.f32 %v3575_v8, %v3560_v13  ;;  %v3900_v8 = vld [vmem:[%s7552_s22] sm:$0x1] }
 0xb02   :  { %5680 = vmatmul.mubr.msk.f32.vlgmr.msra.gmra.mrb[72].mxu0 %vm3586_vm0, %v3576_v25  ;;  %v3585_v32 = vadd.f32 %v3584_v20, %v3568_v55 }
 0xb03   :  { %5695 = vmatprep.mubr.msk.f32.mxu0 %vm6213_vm1, %v6214_v11  ;;  %5694 = vmatpush3.msra.mxu0 %v3550_v42 }
 0xb04   :  { %5691 = vmatmul.mubr.msk.f32.vlgmr.msra.gmra.mrb[64].mxu1 %vm3586_vm0, %v3585_v32  ;;  %6117 = vmatprep.subr.bf16.mxu0 %v6212_v3 }
 0xb05   :  { %5700 = vmatprep.mubr.msk.f32.mxu1 %vm6213_vm1, %v6214_v11  ;;  %5699 = vmatpush3.msra.mxu1 %v3550_v42 }
 0xb06   :  { %6141 = vmatprep.subr.bf16.mxu1 %v6212_v3 }
 0xbd5   :  { %v3656_v16 = vpop.f32.mrb[72].mxu0 }
 0xbd6   :  { %v3660_v51 = vmul.f32 0.03125, %v3656_v16  ;;  %v5681_v15 = vpop.f32.mrb[73].mxu0 }
 0xbd7   :  { %v3730_v28 = vpop.f32.mrb[64].mxu1 }
 0xbd8   :  { %v3735_v36 = vmul.f32 %v3660_v51, %v3660_v51  ;;  %v3734_v52 = vmul.f32 0.03125, %v3730_v28  ;;  %v5692_v6 = vpop.f32.mrb[65].mxu1 }
 0xbda   :  { %v3736_v17 = vsub.f32 %v3734_v52, %v3735_v36 }
 0xbdc   :  { %v3737_v39 = vadd.f32 1e-05, %v3736_v17 }
 0xbde   :  { %6186 = vrsqrt.f32 %v3737_v39 }
 0xbe8   :  { %v6187_v9 = vpop.eup %6186 }
 0xbe9   :  { %v3739_v38 = vmul.f32 %v6187_v9, %v3551_v53 }
 0xbeb   :  { %5696 = vmatmul.mubr.msk.f32.vlgmr.msra.gmra.mrb[74].mxu0 %vm2733_vm14, %v3739_v38  ;;  %v3740_v57 = vmul.f32 %v3739_v38, %v3660_v51 }
 0xbec   :  { %5711 = vmatprep.mubr.msk.f32.mxu0 %vm6213_vm1, %v6214_v11  ;;  %6119 = vmatpush3.bf16.msra.mxu0 %v6118_v49 }
 0xbed   :  { %v3741_v58 = vsub.f32 %v3552_v12, %v3740_v57  ;;  %6120 = vmatprep.subr.bf16.mxu0 %v6212_v3 }
 0xbef   :  { %5701 = vmatmul.mubr.msk.f32.vlgmr.msra.gmra.mrb[66].mxu1 %vm2733_vm14, %v3741_v58 }
 0xbf0   :  { %5755 = vmatprep.mubr.msk.f32.mxu1 %vm6213_vm1, %v6214_v11  ;;  %6143 = vmatpush3.bf16.msra.mxu1 %v6118_v49 }
 0xbf1   :  { %6144 = vmatprep.subr.bf16.mxu1 %v6212_v3  ;;  %6122 = vmatpush3.bf16.msra.mxu0 %v6121_v31 }
 0xbf2   :  { %6123 = vmatprep.subr.bf16.mxu0 %v6212_v3 }
 0xbf4   :  { %6146 = vmatpush3.bf16.msra.mxu1 %v6121_v31 }
 0xbf5   :  { %6147 = vmatprep.subr.bf16.mxu1 %v6212_v3 }
 0xcbe   :  { %v3811_v62 = vpop.f32.mrb[74].mxu0 }
 0xcbf   :  { %v3891_v0 = vrot.slane %v3811_v62, %v7060_v40  ;;  %v5697_v1 = vpop.f32.mrb[75].mxu0 }
 0xcc1   :  { %v3892_v7 = vmul.f32 %v3891_v0, %v7392_v61  ;;  %v3898_v35 = vmul.f32 %v3891_v0, %v7399_v29  ;;  %v6127_v61 = vpack.c.bf16 %v4683_v5, %v4682_v56  ;;  %v4686_v29 = vld [vmem:[%s7551_s21 + $0x48] sm:$0xff] }
 0xcc2   :  { %v3884_v2 = vpop.f32.mrb[66].mxu1 }
 0xcc3   :  { %v3896_v14 = vrot.slane %v3884_v2, %v7060_v40  ;;  %v5702_v18 = vpop.f32.mrb[67].mxu1  ;;  %v4685_v40 = vld [vmem:[%s7551_s21 + $0x40] sm:$0xff] }
 0xcc4   :  { %v6130_v21 = vpack.c.bf16 %v4686_v29, %v4685_v40 }
 0xcc5   :  { %v3897_v54 = vadd.f32 %v3896_v14, %v3892_v7  ;;  %v3899_v63 = vadd.f32 %v3898_v35, %v3896_v14 }
 0xcc7   :  { %5712 = vmatmul.mubr.msk.f32.vlgmr.msra.gmra.mrb[76].mxu0 %vm3586_vm0, %v3897_v54  ;;  %5756 = vmatmul.mubr.msk.f32.vlgmr.msra.gmra.mrb[68].mxu1 %vm3586_vm0, %v3899_v63  ;;  %v3984_v22 = vrot.slane %v3897_v54, 1  ;;  %v4300_v27 = vrot.slane %v3899_v63, 1  ;;  %v4063_v19 = vrot.slane %v3897_v54, 2  ;;  %v4378_v44 = vrot.slane %v3899_v63, 2 }
 0xcc8   :  { %6125 = vmatpush3.bf16.msra.mxu0 %v6124_v59  ;;  %6149 = vmatpush3.bf16.msra.mxu1 %v6124_v59  ;;  %v4142_v45 = vrot.slane %v3897_v54, 3  ;;  %v4456_v13 = vrot.slane %v3899_v63, 3 }
 0xcc9   :  { %6126 = vmatprep.subr.bf16.mxu0 %v6212_v3  ;;  %6150 = vmatprep.subr.bf16.mxu1 %v6212_v3 }
 0xcca   :  { %5722 = vmatprep.mubr.msk.f32.mxu0 %vm6213_vm1, %v6214_v11  ;;  %5766 = vmatprep.mubr.msk.f32.mxu1 %vm6213_vm1, %v6214_v11 }
 0xccc   :  { %6128 = vmatpush3.bf16.msra.mxu0 %v6127_v61  ;;  %6152 = vmatpush3.bf16.msra.mxu1 %v6127_v61 }
 0xccd   :  { %6129 = vmatprep.subr.bf16.mxu0 %v6212_v3  ;;  %6153 = vmatprep.subr.bf16.mxu1 %v6212_v3 }
 0xccf   :  { %5723 = vmatmul.mubr.msk.f32.vlgmr.msra.gmra.mrb[76].mxu0 %vm3586_vm0, %v3984_v22  ;;  %5767 = vmatmul.mubr.msk.f32.vlgmr.msra.gmra.mrb[68].mxu1 %vm3586_vm0, %v4300_v27 }
 0xcd0   :  { %6131 = vmatpush3.bf16.msra.mxu0 %v6130_v21  ;;  %6155 = vmatpush3.bf16.msra.mxu1 %v6130_v21 }
 0xcd1   :  { %6132 = vmatprep.subr.bf16.mxu0 %v6212_v3  ;;  %6156 = vmatprep.subr.bf16.mxu1 %v6212_v3 }
 0xcd2   :  { %5733 = vmatprep.mubr.msk.f32.mxu0 %vm6213_vm1, %v6214_v11  ;;  %5777 = vmatprep.mubr.msk.f32.mxu1 %vm6213_vm1, %v6214_v11 }
 0xcd4   :  { %6134 = vmatpush3.bf16.msra.mxu0 %v6133_v33  ;;  %6158 = vmatpush3.bf16.msra.mxu1 %v6133_v33 }
 0xcd5   :  { %6135 = vmatprep.subr.bf16.mxu0 %v6212_v3  ;;  %6159 = vmatprep.subr.bf16.mxu1 %v6212_v3 }
 0xcd7   :  { %5734 = vmatmul.mubr.msk.f32.vlgmr.msra.gmra.mrb[76].mxu0 %vm3586_vm0, %v4063_v19  ;;  %5778 = vmatmul.mubr.msk.f32.vlgmr.msra.gmra.mrb[68].mxu1 %vm3586_vm0, %v4378_v44 }
 0xcd8   :  { %6137 = vmatpush3.bf16.msra.mxu0 %v6136_v47  ;;  %6161 = vmatpush3.bf16.msra.mxu1 %v6136_v47 }
 0xcd9   :  { %6138 = vmatprep.subr.bf16.mxu0 %v6212_v3  ;;  %6162 = vmatprep.subr.bf16.mxu1 %v6212_v3 }
 0xcda   :  { %5744 = vmatprep.mubr.msk.f32.mxu0 %vm6213_vm1, %v6214_v11  ;;  %5788 = vmatprep.mubr.msk.f32.mxu1 %vm6213_vm1, %v6214_v11 }
 0xcdc   :  { %6140 = vmatpush3.bf16.msra.mxu0 %v6139_v23  ;;  %6164 = vmatpush3.bf16.msra.mxu1 %v6139_v23 }
 0xcdf   :  { %5745 = vmatmul.mubr.msk.f32.vlgmr.msra.gmra.mrb[76].mxu0 %vm3586_vm0, %v4142_v45  ;;  %5789 = vmatmul.mubr.msk.f32.vlgmr.msra.gmra.mrb[68].mxu1 %vm3586_vm0, %v4456_v13 }
 0xdb2   :  { %v4211_v3 = vpop.f32.mrb[76].mxu0  ;;  %v4525_v24 = vpop.f32.mrb[68].mxu1 }
 0xdb3   :  { %v6165_v55 = vadd.f32 %v4211_v3, %v3900_v8  ;;  %v6166_v20 = vadd.f32 %v4525_v24, %v3900_v8  ;;  %v5746_v11 = vpop.f32.mrb[77].mxu0  ;;  %v5790_v25 = vpop.f32.mrb[69].mxu1 }
 0xdb5   :  { %4217 = vst.msk [vmem:[#allocation2] sm:$0x1] %vm4216_vm2, %v6165_v55  ;;  %4530 = vst.msk [vmem:[#allocation2 + $0x1] sm:$0x1] %vm4216_vm2, %v6166_v20 }
 0xdb6   :  { %6199 = shalt.err (!%p6196_p4)
}
 0xdb7   :  { %s6200_s14 = scalar_lea.hbm %s7553_s23, 32 }
 0xdb8   :  { %p6201_p5 = scmp.ne.s32.totalorder %s7553_s23, %s6200_s14  ;;  %p6204_p6 = scmp.lt.u32.totalorder %s6200_s14, %s7553_s23 }
 0xdba   :  { %p6206_p7 = pnand %p6204_p6, %p6201_p5 }
 0xdbc   :  { %6209 = shalt.err (!%p6206_p7)
}
 0xdbd   :  { %4540 = dma.vmem_to_hbm [thread:$0]  %s4538_s25, 32, %s7553_s23, [#allocation3]  }
 0xdbe   :  { %6210 = dma.done.wait [#allocation3], 32  }
 0xdbf   :  { %6211 = vsyncadd [#allocation3], 4294967264 }
 0xdc0   :  { %4544 = vsyncpa [#allocation3], 1 }

</bundles_post_ra>
